<compile_context>
chip_gen: v6e
topology: v6e:2x2x1
jax: 0.10.0
libtpu: 0.0.40
codegen_flags: <defaults>
</compile_context>

<pallas_src>
import jax
import jax.numpy as jnp
from jax.experimental import pallas as pl
from jax.experimental.pallas import tpu as pltpu

_LANE = 128
_SUB = 8


def _round_up(x, m):
    return (x + m - 1) // m * m


def model_and_loss_forward(data_nchw, target, mix_target, params):
    """Mirrors ModelAndLoss.forward(data, target, mix_target)."""
    B = data_nchw.shape[0]
    x = data_nchw.reshape(B, -1).astype(jnp.float32)   # NCHW -> [B, C*H*W] (a view)
    D = x.shape[1]

    if mix_target:
        targets, shuffled_targets, lam = target
    else:
        targets, shuffled_targets, lam = target, target, 1.0

    w1, b1, w2a, b2a, w2b, b2b = params
    Hid = w1.shape[1]
    K = w2a.shape[1]

    # ---- geometry (lane-dense, (8,128)-aligned blocks) ----------------------------
    KP = _round_up(K, _LANE)                       # per-head padded class dim
    # v6e/v7x MXUs are 256 wide: fill them on the dominant GEMM when Hid > 128.
    HIDP = _round_up(Hid, _LANE) if Hid <= _LANE else _round_up(Hid, 2 * _LANE)

    # Batch tiling: avoid padding whenever possible (block == full dim is always legal),
    # keep >= 2 batch tiles when the batch is big enough so both v7x TensorCores work.
    TB_CAP = 256
    if B <= TB_CAP:
        TB, BP = B, B
        if B > 128 and B % (2 * _SUB) == 0:
            TB = B // 2                            # 2 tiles -> megacore-parallel on v7x
    else:
        TB = TB_CAP
        for cand in (256, 128):
            if B % cand == 0:
                TB = cand
                break
        BP = _round_up(B, TB)

    # D (reduction) tiling: prefer reading x straight from HBM (no pad/cast pass over
    # the largest tensor). Large tiles (512-2048) keep the pipeline near HBM roofline.
    if D <= 1024:
        TD, DP = D, D
    else:
        TD = 0
        for cand in range(2048, 511, -_LANE):      # largest 128-multiple that divides D
            if D % cand == 0:
                TD = cand
                break
        if TD:
            DP = D
        else:
            TD, DP = 1024, _round_up(D, 1024)      # ragged fallback: padded copy below

    assert BP % TB == 0 and DP % TD == 0
    nb, nd = BP // TB, DP // TD

    # ---- operands -----------------------------------------------------------------
    needs_pad = (BP != B) or (DP != D)
    if needs_pad:
        # Fallback only: a single bf16 padded copy of x (zero rows/cols are harmless:
        # zero targets -> zero loss contribution; zero x cols hit zero w1 rows).
        xp = jnp.zeros((BP, DP), jnp.bfloat16).at[:B, :D].set(x.astype(jnp.bfloat16))
    else:
        xp = x   # f32, read once by the kernel and cast to bf16 on the VPU

    # NOTE: in a real training loop the padded bf16 weights below would be prepared
    # once outside the step; here they are built per call for self-containment.
    w1p = jnp.zeros((DP, HIDP), jnp.bfloat16).at[:D, :Hid].set(w1.astype(jnp.bfloat16))
    b1p = jnp.zeros((1, HIDP), jnp.float32).at[:, :Hid].set(
        b1.astype(jnp.float32).reshape(1, Hid))

    def _pad_head(w, b):
        wp = jnp.zeros((HIDP, KP), jnp.bfloat16).at[:Hid, :K].set(w.astype(jnp.bfloat16))
        bp = jnp.zeros((1, KP), jnp.float32).at[:, :K].set(
            b.astype(jnp.float32).reshape(1, K))
        return wp, bp

    w2ap, b2ap = _pad_head(w2a, b2a)
    w2bp, b2bp = _pad_head(w2b, b2b)
    w2p = jnp.concatenate([w2ap, w2bp], axis=1)    # (HIDP, 2*KP) fused two-head weight
    b2p = jnp.concatenate([b2ap, b2bp], axis=1)    # (1, 2*KP)

    tgtp = jnp.zeros((BP, KP), jnp.float32).at[:B, :K].set(targets.astype(jnp.float32))
    shufp = jnp.zeros((BP, KP), jnp.float32).at[:B, :K].set(
        shuffled_targets.astype(jnp.float32))
    lamp = jnp.full((1, KP), lam, dtype=jnp.float32)

    inv_2b = 1.0 / (2.0 * B)   # fused (L1+L2)/2 with mean over the true batch size

    # ---- kernel ---------------------------------------------------------------------
    def kernel(lam_ref, x_ref, w1_ref, b1_ref, w2_ref, b2_ref,
               tgt_ref, shuf_ref, out_ref, loss_ref, h_acc):
        kk = pl.program_id(1)

        @pl.when(kk == 0)
        def _():
            h_acc[...] = jnp.zeros_like(h_acc)

        # partial hidden GEMM over this D tile (bf16 in, f32 accumulate on the MXU);
        # the f32->bf16 cast of the x tile happens on the VPU and hides under the MXU.
        h_acc[...] += jnp.dot(x_ref[...].astype(jnp.bfloat16), w1_ref[...],
                              preferred_element_type=jnp.float32)

        @pl.when(kk == nd - 1)
        def _():
            # mixup target mixing (hoisted: once per batch tile)
            lam_row = lam_ref[...]                                        # (1, KP)
            tmix = lam_row * tgt_ref[...] + (1.0 - lam_row) * shuf_ref[...]

            h = jnp.maximum(h_acc[...] + b1_ref[...], 0.0)                # (TB, HIDP) f32
            # fused two-head GEMM -> (TB, 2*KP)
            o = jnp.dot(h.astype(jnp.bfloat16), w2_ref[...],
                        preferred_element_type=jnp.float32) + b2_ref[...]
            o1 = o[:, :KP]
            o2 = o[:, KP:]
            # output = (o1 + o2) / 2  (single lane-dense store)
            out_ref[...] = 0.5 * (o1 + o2)

            # soft-CE per head on lane-aligned slices (no concatenates, one shared mask)
            if K != KP:
                lane = jax.lax.broadcasted_iota(jnp.int32, (TB, KP), 1)
                valid = lane < K
            else:
                valid = None

            def head_nll(oh):
                if valid is not None:
                    oh = jnp.where(valid, oh, -1e30)
                m = jnp.max(oh, axis=-1, keepdims=True)
                z = oh - m
                lse = jnp.log(jnp.sum(jnp.exp(z), axis=-1, keepdims=True))
                # padded lanes/rows have tmix == 0, so they contribute exactly 0
                return jnp.sum(tmix * (z - lse))

            loss_tile = -(head_nll(o1) + head_nll(o2)) * inv_2b
            loss_ref[...] = jnp.full(loss_ref.shape, loss_tile, jnp.float32)

    # ---- cost hint (counts the nb-fold re-streaming of w1) ---------------------------
    w1_passes = nb if nd > 1 else 1
    flops = 2 * BP * DP * HIDP + 2 * BP * HIDP * (2 * KP) + 12 * BP * KP
    bytes_accessed = (xp.size * xp.dtype.itemsize +
                      w1_passes * w1p.size * 2 + w2p.size * 2 +
                      b1p.size * 4 + b2p.size * 4 +
                      tgtp.size * 4 + shufp.size * 4 + lamp.size * 4 +
                      BP * KP * 4 + nb * _SUB * _LANE * 4)
    cost = pl.CostEstimate(flops=flops, transcendentals=2 * BP * KP,
                           bytes_accessed=bytes_accessed)

    def _build(single_buffer_consts):
        # Never-changing operands don't need a second pipeline buffer: halves their
        # VMEM footprint (matters for the resident fused w2 on v7x's 64 MiB VMEM).
        const_kw = ({"pipeline_mode": pl.Buffered(1)}
                    if single_buffer_consts else {})
        in_specs = [
            pl.BlockSpec((1, KP), lambda i, k: (0, 0), **const_kw),          # lam row
            pl.BlockSpec((TB, TD), lambda i, k: (i, k)),                     # x
            pl.BlockSpec((TD, HIDP), lambda i, k: (k, 0)),                   # w1
            pl.BlockSpec((1, HIDP), lambda i, k: (0, 0), **const_kw),        # b1
            pl.BlockSpec((HIDP, 2 * KP), lambda i, k: (0, 0), **const_kw),   # fused w2
            pl.BlockSpec((1, 2 * KP), lambda i, k: (0, 0), **const_kw),      # fused b2
            pl.BlockSpec((TB, KP), lambda i, k: (i, 0)),                     # targets
            pl.BlockSpec((TB, KP), lambda i, k: (i, 0)),                     # shuffled
        ]
        out_specs = (
            pl.BlockSpec((TB, KP), lambda i, k: (i, 0)),                     # avg logits
            pl.BlockSpec((1, _SUB, _LANE), lambda i, k: (i, 0, 0)),          # loss parts
        )
        return pl.pallas_call(
            kernel,
            out_shape=(jax.ShapeDtypeStruct((BP, KP), jnp.float32),
                       jax.ShapeDtypeStruct((nb, _SUB, _LANE), jnp.float32)),
            grid_spec=pltpu.PrefetchScalarGridSpec(
                num_scalar_prefetch=0,
                grid=(nb, nd),                                  # reduction axis last
                in_specs=in_specs,
                out_specs=out_specs,
                scratch_shapes=[pltpu.VMEM((TB, HIDP), jnp.float32)],  # h accumulator
            ),
            compiler_params=pltpu.CompilerParams(
                dimension_semantics=("parallel", "arbitrary"),   # batch tiles across TCs
                vmem_limit_bytes=64 * 1024 * 1024),
            cost_estimate=cost,
        )

    args = (lamp, xp, w1p, b1p, w2p, b2p, tgtp, shufp)
    try:
        out_pad, loss_parts = _build(True)(*args)
    except Exception:
        # This JAX build does not accept pipeline_mode=pl.Buffered(1); use defaults.
        out_pad, loss_parts = _build(False)(*args)

    loss = jnp.sum(loss_parts[:, 0, 0])
    output = out_pad[:B, :K]
    return loss, output


def init_params(key, d_in, hidden, n_classes):
    k1, k2, k3 = jax.random.split(key, 3)
    w1 = jax.random.normal(k1, (d_in, hidden), jnp.float32) * (1.0 / jnp.sqrt(d_in))
    b1 = jnp.zeros((1, hidden), jnp.float32)
    w2a = jax.random.normal(k2, (hidden, n_classes), jnp.float32) * (1.0 / jnp.sqrt(hidden))
    b2a = jnp.zeros((1, n_classes), jnp.float32)
    w2b = jax.random.normal(k3, (hidden, n_classes), jnp.float32) * (1.0 / jnp.sqrt(hidden))
    b2b = jnp.zeros((1, n_classes), jnp.float32)
    return (w1, b1, w2a, b2a, w2b, b2b)


def _reference_forward(data_nchw, target, mix_target, params):
    """Pure-JAX f32 reference of ModelAndLoss.forward for the concrete model/loss."""
    B = data_nchw.shape[0]
    x = data_nchw.reshape(B, -1).astype(jnp.float32)
    if mix_target:
        t, s, lam = target
        t = lam * t + (1.0 - lam) * s
    else:
        t = target
    w1, b1, w2a, b2a, w2b, b2b = params
    h = jnp.maximum(x @ w1 + b1, 0.0)
    o1 = h @ w2a + b2a
    o2 = h @ w2b + b2b

    def ce(o):
        logp = jax.nn.log_softmax(o, axis=-1)
        return -jnp.mean(jnp.sum(t * logp, axis=-1))

    return (ce(o1) + ce(o2)) / 2.0, (o1 + o2) / 2.0


def _check_case(data, target, mix_target, params, B, K):
    loss, output = model_and_loss_forward(data, target, mix_target, params)
    jax.block_until_ready((loss, output))
    ref_loss, ref_out = _reference_forward(data, target, mix_target, params)
    assert output.shape == (B, K)
    assert bool(jnp.isfinite(loss)) and bool(jnp.all(jnp.isfinite(output)))
    assert bool(jnp.allclose(output, ref_out, atol=2e-1, rtol=2e-1))
    assert bool(jnp.allclose(loss, ref_loss, atol=2e-1, rtol=2e-1))


if __name__ == "__main__":
    key = jax.random.PRNGKey(0)

    # ---- case 1: small mixup case (single tile, K < 128 masking path) ---------------
    B, C, H, W = 2, 4, 16, 16
    HIDDEN, K = 32, 16
    kx, kt, ks, kp, key = jax.random.split(key, 5)
    data = jax.random.normal(kx, (B, C, H, W), jnp.float32)            # NCHW, as in PyTorch
    targets = jax.nn.one_hot(jax.random.randint(kt, (B,), 0, K), K).astype(jnp.float32)
    shuffled = jax.nn.one_hot(jax.random.randint(ks, (B,), 0, K), K).astype(jnp.float32)
    params = init_params(kp, C * H * W, HIDDEN, K)
    _check_case(data, (targets, shuffled, 0.7), True, params, B, K)

    # ---- case 2: multi-tile case (2 batch tiles x 2 D tiles, Hid > 128, no mixup) ----
    B2, C2, H2, W2 = 256, 4, 24, 24
    HIDDEN2, K2 = 160, 10
    kx2, kt2, kp2 = jax.random.split(key, 3)
    data2 = jax.random.normal(kx2, (B2, C2, H2, W2), jnp.float32)
    targets2 = jax.nn.one_hot(jax.random.randint(kt2, (B2,), 0, K2), K2).astype(jnp.float32)
    params2 = init_params(kp2, C2 * H2 * W2, HIDDEN2, K2)
    _check_case(data2, targets2, False, params2, B2, K2)

    print("KERNEL_OK")
</pallas_src>

<mosaic_0001>
module attributes {stable_mosaic.version = 11 : i64} {
  func.func @kernel(%arg0: i32, %arg1: i32, %arg2: memref<1x128xf32, #tpu.memory_space<vmem>>, %arg3: memref<2x1024xf32, #tpu.memory_space<vmem>>, %arg4: memref<1024x128xbf16, #tpu.memory_space<vmem>>, %arg5: memref<1x128xf32, #tpu.memory_space<vmem>>, %arg6: memref<128x256xbf16, #tpu.memory_space<vmem>>, %arg7: memref<1x256xf32, #tpu.memory_space<vmem>>, %arg8: memref<2x128xf32, #tpu.memory_space<vmem>>, %arg9: memref<2x128xf32, #tpu.memory_space<vmem>>, %arg10: memref<2x128xf32, #tpu.memory_space<vmem>>, %arg11: memref<1x8x128xf32, #tpu.memory_space<vmem>>, %arg12: memref<2x128xf32, #tpu.memory_space<vmem>>) attributes {dimension_semantics = [#tpu.dimension_semantics<parallel>, #tpu.dimension_semantics<arbitrary>], iteration_bounds = array<i64: 1, 1>, scalar_prefetch = 0 : i64, scratch_operands = 1 : i64, tpu.core_type = #tpu.core_type<tc>, window_params = [{pipeline_mode = #tpu.pipeline_mode<synchronous>, transform_indices = @transform_0, window_bounds = array<i64: 1, 128>}, {transform_indices = @transform_1, window_bounds = array<i64: 2, 1024>}, {transform_indices = @transform_2, window_bounds = array<i64: 1024, 128>}, {pipeline_mode = #tpu.pipeline_mode<synchronous>, transform_indices = @transform_3, window_bounds = array<i64: 1, 128>}, {pipeline_mode = #tpu.pipeline_mode<synchronous>, transform_indices = @transform_4, window_bounds = array<i64: 128, 256>}, {pipeline_mode = #tpu.pipeline_mode<synchronous>, transform_indices = @transform_5, window_bounds = array<i64: 1, 256>}, {transform_indices = @transform_6, window_bounds = array<i64: 2, 128>}, {transform_indices = @transform_7, window_bounds = array<i64: 2, 128>}, {transform_indices = @transform_8, window_bounds = array<i64: 2, 128>}, {transform_indices = @transform_9, window_bounds = array<i64: 1, 8, 128>}]} {
    %c0_i32 = arith.constant 0 : i32
    %0 = arith.cmpi eq, %arg1, %c0_i32 : i32
    %1 = arith.extui %0 : i1 to i32
    %c0_i32_0 = arith.constant 0 : i32
    %2 = arith.cmpi ne, %1, %c0_i32_0 : i32
    scf.if %2 {
      %cst_10 = arith.constant 0.000000e+00 : f32
      %13 = vector.broadcast %cst_10 : f32 to vector<2x128xf32>
      %c0_11 = arith.constant 0 : index
      %c0_12 = arith.constant 0 : index
      %14 = vector.load %arg12[%c0_11, %c0_12] : memref<2x128xf32, #tpu.memory_space<vmem>>, vector<2x128xf32>
      tpu.vector_store %arg12[%c0_11, %c0_12], %13 {strides = array<i32>} : memref<2x128xf32, #tpu.memory_space<vmem>>, vector<2x128xf32>,
    } else {
    }
    %c0 = arith.constant 0 : index
    %c0_1 = arith.constant 0 : index
    %3 = vector.load %arg12[%c0, %c0_1] : memref<2x128xf32, #tpu.memory_space<vmem>>, vector<2x128xf32>
    %c0_2 = arith.constant 0 : index
    %c0_3 = arith.constant 0 : index
    %4 = vector.load %arg3[%c0_2, %c0_3] : memref<2x1024xf32, #tpu.memory_space<vmem>>, vector<2x1024xf32>
    %5 = arith.truncf %4 : vector<2x1024xf32> to vector<2x1024xbf16>
    %c0_4 = arith.constant 0 : index
    %c0_5 = arith.constant 0 : index
    %6 = vector.load %arg4[%c0_4, %c0_5] : memref<1024x128xbf16, #tpu.memory_space<vmem>>, vector<1024x128xbf16>
    %cst = arith.constant dense<0.000000e+00> : vector<2x128xf32>
    %7 = tpu.matmul %5, %6, %cst {dimension_numbers = #tpu.dot_dimension_numbers<[1], [0], [0], [1], [0, 0, 1, 1], [], []>} : vector<2x1024xbf16>, vector<1024x128xbf16>, vector<2x128xf32> -> vector<2x128xf32>
    %8 = arith.addf %3, %7 : vector<2x128xf32>
    %c0_6 = arith.constant 0 : index
    %c0_7 = arith.constant 0 : index
    %9 = vector.load %arg12[%c0_6, %c0_7] : memref<2x128xf32, #tpu.memory_space<vmem>>, vector<2x128xf32>
    tpu.vector_store %arg12[%c0_6, %c0_7], %8 {strides = array<i32>} : memref<2x128xf32, #tpu.memory_space<vmem>>, vector<2x128xf32>,
    %c0_i32_8 = arith.constant 0 : i32
    %10 = arith.cmpi eq, %arg1, %c0_i32_8 : i32
    %11 = arith.extui %10 : i1 to i32
    %c0_i32_9 = arith.constant 0 : i32
    %12 = arith.cmpi ne, %11, %c0_i32_9 : i32
    scf.if %12 {
      %c0_10 = arith.constant 0 : index
      %c0_11 = arith.constant 0 : index
      %13 = vector.load %arg2[%c0_10, %c0_11] : memref<1x128xf32, #tpu.memory_space<vmem>>, vector<1x128xf32>
      %c0_12 = arith.constant 0 : index
      %c0_13 = arith.constant 0 : index
      %14 = vector.load %arg8[%c0_12, %c0_13] : memref<2x128xf32, #tpu.memory_space<vmem>>, vector<2x128xf32>
      %15 = vector.broadcast %13 : vector<1x128xf32> to vector<2x128xf32>
      %16 = arith.mulf %15, %14 : vector<2x128xf32>
      %cst_14 = arith.constant 1.000000e+00 : f32
      %17 = vector.broadcast %cst_14 : f32 to vector<1x128xf32>
      %18 = arith.subf %17, %13 : vector<1x128xf32>
      %c0_15 = arith.constant 0 : index
      %c0_16 = arith.constant 0 : index
      %19 = vector.load %arg9[%c0_15, %c0_16] : memref<2x128xf32, #tpu.memory_space<vmem>>, vector<2x128xf32>
      %20 = vector.broadcast %18 : vector<1x128xf32> to vector<2x128xf32>
      %21 = arith.mulf %20, %19 : vector<2x128xf32>
      %22 = arith.addf %16, %21 : vector<2x128xf32>
      %c0_17 = arith.constant 0 : index
      %c0_18 = arith.constant 0 : index
      %23 = vector.load %arg12[%c0_17, %c0_18] : memref<2x128xf32, #tpu.memory_space<vmem>>, vector<2x128xf32>
      %c0_19 = arith.constant 0 : index
      %c0_20 = arith.constant 0 : index
      %24 = vector.load %arg5[%c0_19, %c0_20] : memref<1x128xf32, #tpu.memory_space<vmem>>, vector<1x128xf32>
      %25 = vector.broadcast %24 : vector<1x128xf32> to vector<2x128xf32>
      %26 = arith.addf %23, %25 : vector<2x128xf32>
      %cst_21 = arith.constant 0.000000e+00 : f32
      %27 = vector.broadcast %cst_21 : f32 to vector<2x128xf32>
      %28 = arith.maximumf %26, %27 : vector<2x128xf32>
      %29 = arith.truncf %28 : vector<2x128xf32> to vector<2x128xbf16>
      %c0_22 = arith.constant 0 : index
      %c0_23 = arith.constant 0 : index
      %30 = vector.load %arg6[%c0_22, %c0_23] : memref<128x256xbf16, #tpu.memory_space<vmem>>, vector<128x256xbf16>
      %cst_24 = arith.constant dense<0.000000e+00> : vector<2x256xf32>
      %31 = tpu.matmul %29, %30, %cst_24 {dimension_numbers = #tpu.dot_dimension_numbers<[1], [0], [0], [1], [0, 0, 1, 1], [], []>} : vector<2x128xbf16>, vector<128x256xbf16>, vector<2x256xf32> -> vector<2x256xf32>
      %c0_25 = arith.constant 0 : index
      %c0_26 = arith.constant 0 : index
      %32 = vector.load %arg7[%c0_25, %c0_26] : memref<1x256xf32, #tpu.memory_space<vmem>>, vector<1x256xf32>
      %33 = vector.broadcast %32 : vector<1x256xf32> to vector<2x256xf32>
      %34 = arith.addf %31, %33 : vector<2x256xf32>
      %35 = vector.extract_strided_slice %34 {offsets = [0, 0], sizes = [2, 128], strides = [1, 1]} : vector<2x256xf32> to vector<2x128xf32>
      %36 = vector.extract_strided_slice %34 {offsets = [0, 128], sizes = [2, 128], strides = [1, 1]} : vector<2x256xf32> to vector<2x128xf32>
      %37 = arith.addf %35, %36 : vector<2x128xf32>
      %cst_27 = arith.constant 5.000000e-01 : f32
      %38 = vector.broadcast %cst_27 : f32 to vector<2x128xf32>
      %39 = arith.mulf %38, %37 : vector<2x128xf32>
      %c0_28 = arith.constant 0 : index
      %c0_29 = arith.constant 0 : index
      %40 = vector.load %arg10[%c0_28, %c0_29] : memref<2x128xf32, #tpu.memory_space<vmem>>, vector<2x128xf32>
      tpu.vector_store %arg10[%c0_28, %c0_29], %39 {strides = array<i32>} : memref<2x128xf32, #tpu.memory_space<vmem>>, vector<2x128xf32>,
      %41 = tpu.iota {dimensions = array<i32: 1>} : vector<2x128xi32>
      %c16_i32 = arith.constant 16 : i32
      %42 = vector.broadcast %c16_i32 : i32 to vector<2x128xi32>
      %43 = arith.cmpi slt, %41, %42 : vector<2x128xi32>
      %cst_30 = arith.constant -1.000000e+30 : f32
      %44 = vector.broadcast %cst_30 : f32 to vector<2x128xf32>
      %45 = arith.select %43, %35, %44 : vector<2x128xi1>, vector<2x128xf32>
      %cst_31 = arith.constant dense<0xFF800000> : vector<2xf32>
      %46 = vector.multi_reduction <maximumf>, %45, %cst_31 [1] : vector<2x128xf32> to vector<2xf32>
      %47 = vector.shape_cast %46 : vector<2xf32> to vector<2x1xf32>
      %48 = vector.broadcast %47 : vector<2x1xf32> to vector<2x128xf32>
      %49 = arith.subf %45, %48 : vector<2x128xf32>
      %50 = math.exp %49 : vector<2x128xf32>
      %cst_32 = arith.constant dense<0.000000e+00> : vector<2xf32>
      %51 = vector.multi_reduction <add>, %50, %cst_32 [1] : vector<2x128xf32> to vector<2xf32>
      %52 = vector.shape_cast %51 : vector<2xf32> to vector<2x1xf32>
      %53 = math.log %52 : vector<2x1xf32>
      %54 = vector.broadcast %53 : vector<2x1xf32> to vector<2x128xf32>
      %55 = arith.subf %49, %54 : vector<2x128xf32>
      %56 = arith.mulf %22, %55 : vector<2x128xf32>
      %57 = vector.shape_cast %56 : vector<2x128xf32> to vector<1x2x128xf32>
      %cst_33 = arith.constant dense<0.000000e+00> : vector<1xf32>
      %58 = vector.multi_reduction <add>, %57, %cst_33 [1, 2] : vector<1x2x128xf32> to vector<1xf32>
      %59 = vector.shape_cast %58 : vector<1xf32> to vector<1x1x1xf32>
      %60 = vector.extract %59[0, 0, 0] : f32 from vector<1x1x1xf32>
      %cst_34 = arith.constant -1.000000e+30 : f32
      %61 = vector.broadcast %cst_34 : f32 to vector<2x128xf32>
      %62 = arith.select %43, %36, %61 : vector<2x128xi1>, vector<2x128xf32>
      %cst_35 = arith.constant dense<0xFF800000> : vector<2xf32>
      %63 = vector.multi_reduction <maximumf>, %62, %cst_35 [1] : vector<2x128xf32> to vector<2xf32>
      %64 = vector.shape_cast %63 : vector<2xf32> to vector<2x1xf32>
      %65 = vector.broadcast %64 : vector<2x1xf32> to vector<2x128xf32>
      %66 = arith.subf %62, %65 : vector<2x128xf32>
      %67 = math.exp %66 : vector<2x128xf32>
      %cst_36 = arith.constant dense<0.000000e+00> : vector<2xf32>
      %68 = vector.multi_reduction <add>, %67, %cst_36 [1] : vector<2x128xf32> to vector<2xf32>
      %69 = vector.shape_cast %68 : vector<2xf32> to vector<2x1xf32>
      %70 = math.log %69 : vector<2x1xf32>
      %71 = vector.broadcast %70 : vector<2x1xf32> to vector<2x128xf32>
      %72 = arith.subf %66, %71 : vector<2x128xf32>
      %73 = arith.mulf %22, %72 : vector<2x128xf32>
      %74 = vector.shape_cast %73 : vector<2x128xf32> to vector<1x2x128xf32>
      %cst_37 = arith.constant dense<0.000000e+00> : vector<1xf32>
      %75 = vector.multi_reduction <add>, %74, %cst_37 [1, 2] : vector<1x2x128xf32> to vector<1xf32>
      %76 = vector.shape_cast %75 : vector<1xf32> to vector<1x1x1xf32>
      %77 = vector.extract %76[0, 0, 0] : f32 from vector<1x1x1xf32>
      %78 = arith.addf %60, %77 : f32
      %cst_38 = arith.constant 0.000000e+00 : f32
      %79 = arith.subf %cst_38, %78 : f32
      %cst_39 = arith.constant 2.500000e-01 : f32
      %80 = arith.mulf %79, %cst_39 : f32
      %81 = vector.broadcast %80 : f32 to vector<1x8x128xf32>
      %c0_40 = arith.constant 0 : index
      %c0_41 = arith.constant 0 : index
      %c0_42 = arith.constant 0 : index
      %82 = vector.load %arg11[%c0_40, %c0_41, %c0_42] : memref<1x8x128xf32, #tpu.memory_space<vmem>>, vector<1x8x128xf32>
      tpu.vector_store %arg11[%c0_40, %c0_41, %c0_42], %81 {strides = array<i32>} : memref<1x8x128xf32, #tpu.memory_space<vmem>>, vector<1x8x128xf32>,
    } else {
    }
    return
  }
  func.func @transform_0(%arg0: i32, %arg1: i32) -> (i32, i32) {
    %c0_i32 = arith.constant 0 : i32
    %c0_i32_0 = arith.constant 0 : i32
    %c0_i32_1 = arith.constant 0 : i32
    return %c0_i32, %c0_i32_0 : i32, i32
  }
  func.func @transform_1(%arg0: i32, %arg1: i32) -> (i32, i32) {
    %c0_i32 = arith.constant 0 : i32
    return %arg0, %arg1 : i32, i32
  }
  func.func @transform_2(%arg0: i32, %arg1: i32) -> (i32, i32) {
    %c0_i32 = arith.constant 0 : i32
    %c0_i32_0 = arith.constant 0 : i32
    return %arg1, %c0_i32 : i32, i32
  }
  func.func @transform_3(%arg0: i32, %arg1: i32) -> (i32, i32) {
    %c0_i32 = arith.constant 0 : i32
    %c0_i32_0 = arith.constant 0 : i32
    %c0_i32_1 = arith.constant 0 : i32
    return %c0_i32, %c0_i32_0 : i32, i32
  }
  func.func @transform_4(%arg0: i32, %arg1: i32) -> (i32, i32) {
    %c0_i32 = arith.constant 0 : i32
    %c0_i32_0 = arith.constant 0 : i32
    %c0_i32_1 = arith.constant 0 : i32
    return %c0_i32, %c0_i32_0 : i32, i32
  }
  func.func @transform_5(%arg0: i32, %arg1: i32) -> (i32, i32) {
    %c0_i32 = arith.constant 0 : i32
    %c0_i32_0 = arith.constant 0 : i32
    %c0_i32_1 = arith.constant 0 : i32
    return %c0_i32, %c0_i32_0 : i32, i32
  }
  func.func @transform_6(%arg0: i32, %arg1: i32) -> (i32, i32) {
    %c0_i32 = arith.constant 0 : i32
    %c0_i32_0 = arith.constant 0 : i32
    return %arg0, %c0_i32 : i32, i32
  }
  func.func @transform_7(%arg0: i32, %arg1: i32) -> (i32, i32) {
    %c0_i32 = arith.constant 0 : i32
    %c0_i32_0 = arith.constant 0 : i32
    return %arg0, %c0_i32 : i32, i32
  }
  func.func @transform_8(%arg0: i32, %arg1: i32) -> (i32, i32) {
    %c0_i32 = arith.constant 0 : i32
    %c0_i32_0 = arith.constant 0 : i32
    return %arg0, %c0_i32 : i32, i32
  }
  func.func @transform_9(%arg0: i32, %arg1: i32) -> (i32, i32, i32) {
    %c0_i32 = arith.constant 0 : i32
    %c0_i32_0 = arith.constant 0 : i32
    %c0_i32_1 = arith.constant 0 : i32
    return %arg0, %c0_i32, %c0_i32_0 : i32, i32, i32
  }
}

module attributes {stable_mosaic.version = 11 : i64} {
  func.func @kernel(%arg0: i32, %arg1: i32, %arg2: memref<1x128xf32, #tpu.memory_space<vmem>>, %arg3: memref<2x1024xf32, #tpu.memory_space<vmem>>, %arg4: memref<1024x128xbf16, #tpu.memory_space<vmem>>, %arg5: memref<1x128xf32, #tpu.memory_space<vmem>>, %arg6: memref<128x256xbf16, #tpu.memory_space<vmem>>, %arg7: memref<1x256xf32, #tpu.memory_space<vmem>>, %arg8: memref<2x128xf32, #tpu.memory_space<vmem>>, %arg9: memref<2x128xf32, #tpu.memory_space<vmem>>, %arg10: memref<2x128xf32, #tpu.memory_space<vmem>>, %arg11: memref<1x8x128xf32, #tpu.memory_space<vmem>>, %arg12: memref<2x128xf32, #tpu.memory_space<vmem>>) attributes {dimension_semantics = [#tpu.dimension_semantics<parallel>, #tpu.dimension_semantics<arbitrary>], iteration_bounds = array<i64: 1, 1>, scalar_prefetch = 0 : i64, scratch_operands = 1 : i64, tpu.core_type = #tpu.core_type<tc>, window_params = [{pipeline_mode = #tpu.pipeline_mode<synchronous>, transform_indices = @transform_0, window_bounds = array<i64: 1, 128>}, {transform_indices = @transform_1, window_bounds = array<i64: 2, 1024>}, {transform_indices = @transform_2, window_bounds = array<i64: 1024, 128>}, {pipeline_mode = #tpu.pipeline_mode<synchronous>, transform_indices = @transform_3, window_bounds = array<i64: 1, 128>}, {pipeline_mode = #tpu.pipeline_mode<synchronous>, transform_indices = @transform_4, window_bounds = array<i64: 128, 256>}, {pipeline_mode = #tpu.pipeline_mode<synchronous>, transform_indices = @transform_5, window_bounds = array<i64: 1, 256>}, {transform_indices = @transform_6, window_bounds = array<i64: 2, 128>}, {transform_indices = @transform_7, window_bounds = array<i64: 2, 128>}, {transform_indices = @transform_8, window_bounds = array<i64: 2, 128>}, {transform_indices = @transform_9, window_bounds = array<i64: 1, 8, 128>}]} {
    %c0_i32 = arith.constant 0 : i32
    %0 = arith.cmpi eq, %arg1, %c0_i32 : i32
    %1 = arith.extui %0 : i1 to i32
    %c0_i32_0 = arith.constant 0 : i32
    %2 = arith.cmpi ne, %1, %c0_i32_0 : i32
    scf.if %2 {
      %cst_10 = arith.constant 0.000000e+00 : f32
      %13 = vector.broadcast %cst_10 : f32 to vector<2x128xf32>
      %c0_11 = arith.constant 0 : index
      %c0_12 = arith.constant 0 : index
      %14 = vector.load %arg12[%c0_11, %c0_12] : memref<2x128xf32, #tpu.memory_space<vmem>>, vector<2x128xf32>
      tpu.vector_store %arg12[%c0_11, %c0_12], %13 {strides = array<i32>} : memref<2x128xf32, #tpu.memory_space<vmem>>, vector<2x128xf32>,
    } else {
    }
    %c0 = arith.constant 0 : index
    %c0_1 = arith.constant 0 : index
    %3 = vector.load %arg12[%c0, %c0_1] : memref<2x128xf32, #tpu.memory_space<vmem>>, vector<2x128xf32>
    %c0_2 = arith.constant 0 : index
    %c0_3 = arith.constant 0 : index
    %4 = vector.load %arg3[%c0_2, %c0_3] : memref<2x1024xf32, #tpu.memory_space<vmem>>, vector<2x1024xf32>
    %5 = arith.truncf %4 : vector<2x1024xf32> to vector<2x1024xbf16>
    %c0_4 = arith.constant 0 : index
    %c0_5 = arith.constant 0 : index
    %6 = vector.load %arg4[%c0_4, %c0_5] : memref<1024x128xbf16, #tpu.memory_space<vmem>>, vector<1024x128xbf16>
    %cst = arith.constant dense<0.000000e+00> : vector<2x128xf32>
    %7 = tpu.matmul %5, %6, %cst {dimension_numbers = #tpu.dot_dimension_numbers<[1], [0], [0], [1], [0, 0, 1, 1], [], []>} : vector<2x1024xbf16>, vector<1024x128xbf16>, vector<2x128xf32> -> vector<2x128xf32>
    %8 = arith.addf %3, %7 : vector<2x128xf32>
    %c0_6 = arith.constant 0 : index
    %c0_7 = arith.constant 0 : index
    %9 = vector.load %arg12[%c0_6, %c0_7] : memref<2x128xf32, #tpu.memory_space<vmem>>, vector<2x128xf32>
    tpu.vector_store %arg12[%c0_6, %c0_7], %8 {strides = array<i32>} : memref<2x128xf32, #tpu.memory_space<vmem>>, vector<2x128xf32>,
    %c0_i32_8 = arith.constant 0 : i32
    %10 = arith.cmpi eq, %arg1, %c0_i32_8 : i32
    %11 = arith.extui %10 : i1 to i32
    %c0_i32_9 = arith.constant 0 : i32
    %12 = arith.cmpi ne, %11, %c0_i32_9 : i32
    scf.if %12 {
      %c0_10 = arith.constant 0 : index
      %c0_11 = arith.constant 0 : index
      %13 = vector.load %arg2[%c0_10, %c0_11] : memref<1x128xf32, #tpu.memory_space<vmem>>, vector<1x128xf32>
      %c0_12 = arith.constant 0 : index
      %c0_13 = arith.constant 0 : index
      %14 = vector.load %arg8[%c0_12, %c0_13] : memref<2x128xf32, #tpu.memory_space<vmem>>, vector<2x128xf32>
      %15 = vector.broadcast %13 : vector<1x128xf32> to vector<2x128xf32>
      %16 = arith.mulf %15, %14 : vector<2x128xf32>
      %cst_14 = arith.constant 1.000000e+00 : f32
      %17 = vector.broadcast %cst_14 : f32 to vector<1x128xf32>
      %18 = arith.subf %17, %13 : vector<1x128xf32>
      %c0_15 = arith.constant 0 : index
      %c0_16 = arith.constant 0 : index
      %19 = vector.load %arg9[%c0_15, %c0_16] : memref<2x128xf32, #tpu.memory_space<vmem>>, vector<2x128xf32>
      %20 = vector.broadcast %18 : vector<1x128xf32> to vector<2x128xf32>
      %21 = arith.mulf %20, %19 : vector<2x128xf32>
      %22 = arith.addf %16, %21 : vector<2x128xf32>
      %c0_17 = arith.constant 0 : index
      %c0_18 = arith.constant 0 : index
      %23 = vector.load %arg12[%c0_17, %c0_18] : memref<2x128xf32, #tpu.memory_space<vmem>>, vector<2x128xf32>
      %c0_19 = arith.constant 0 : index
      %c0_20 = arith.constant 0 : index
      %24 = vector.load %arg5[%c0_19, %c0_20] : memref<1x128xf32, #tpu.memory_space<vmem>>, vector<1x128xf32>
      %25 = vector.broadcast %24 : vector<1x128xf32> to vector<2x128xf32>
      %26 = arith.addf %23, %25 : vector<2x128xf32>
      %cst_21 = arith.constant 0.000000e+00 : f32
      %27 = vector.broadcast %cst_21 : f32 to vector<2x128xf32>
      %28 = arith.maximumf %26, %27 : vector<2x128xf32>
      %29 = arith.truncf %28 : vector<2x128xf32> to vector<2x128xbf16>
      %c0_22 = arith.constant 0 : index
      %c0_23 = arith.constant 0 : index
      %30 = vector.load %arg6[%c0_22, %c0_23] : memref<128x256xbf16, #tpu.memory_space<vmem>>, vector<128x256xbf16>
      %cst_24 = arith.constant dense<0.000000e+00> : vector<2x256xf32>
      %31 = tpu.matmul %29, %30, %cst_24 {dimension_numbers = #tpu.dot_dimension_numbers<[1], [0], [0], [1], [0, 0, 1, 1], [], []>} : vector<2x128xbf16>, vector<128x256xbf16>, vector<2x256xf32> -> vector<2x256xf32>
      %c0_25 = arith.constant 0 : index
      %c0_26 = arith.constant 0 : index
      %32 = vector.load %arg7[%c0_25, %c0_26] : memref<1x256xf32, #tpu.memory_space<vmem>>, vector<1x256xf32>
      %33 = vector.broadcast %32 : vector<1x256xf32> to vector<2x256xf32>
      %34 = arith.addf %31, %33 : vector<2x256xf32>
      %35 = vector.extract_strided_slice %34 {offsets = [0, 0], sizes = [2, 128], strides = [1, 1]} : vector<2x256xf32> to vector<2x128xf32>
      %36 = vector.extract_strided_slice %34 {offsets = [0, 128], sizes = [2, 128], strides = [1, 1]} : vector<2x256xf32> to vector<2x128xf32>
      %37 = arith.addf %35, %36 : vector<2x128xf32>
      %cst_27 = arith.constant 5.000000e-01 : f32
      %38 = vector.broadcast %cst_27 : f32 to vector<2x128xf32>
      %39 = arith.mulf %38, %37 : vector<2x128xf32>
      %c0_28 = arith.constant 0 : index
      %c0_29 = arith.constant 0 : index
      %40 = vector.load %arg10[%c0_28, %c0_29] : memref<2x128xf32, #tpu.memory_space<vmem>>, vector<2x128xf32>
      tpu.vector_store %arg10[%c0_28, %c0_29], %39 {strides = array<i32>} : memref<2x128xf32, #tpu.memory_space<vmem>>, vector<2x128xf32>,
      %41 = tpu.iota {dimensions = array<i32: 1>} : vector<2x128xi32>
      %c16_i32 = arith.constant 16 : i32
      %42 = vector.broadcast %c16_i32 : i32 to vector<2x128xi32>
      %43 = arith.cmpi slt, %41, %42 : vector<2x128xi32>
      %cst_30 = arith.constant -1.000000e+30 : f32
      %44 = vector.broadcast %cst_30 : f32 to vector<2x128xf32>
      %45 = arith.select %43, %35, %44 : vector<2x128xi1>, vector<2x128xf32>
      %cst_31 = arith.constant dense<0xFF800000> : vector<2xf32>
      %46 = vector.multi_reduction <maximumf>, %45, %cst_31 [1] : vector<2x128xf32> to vector<2xf32>
      %47 = vector.shape_cast %46 : vector<2xf32> to vector<2x1xf32>
      %48 = vector.broadcast %47 : vector<2x1xf32> to vector<2x128xf32>
      %49 = arith.subf %45, %48 : vector<2x128xf32>
      %50 = math.exp %49 : vector<2x128xf32>
      %cst_32 = arith.constant dense<0.000000e+00> : vector<2xf32>
      %51 = vector.multi_reduction <add>, %50, %cst_32 [1] : vector<2x128xf32> to vector<2xf32>
      %52 = vector.shape_cast %51 : vector<2xf32> to vector<2x1xf32>
      %53 = math.log %52 : vector<2x1xf32>
      %54 = vector.broadcast %53 : vector<2x1xf32> to vector<2x128xf32>
      %55 = arith.subf %49, %54 : vector<2x128xf32>
      %56 = arith.mulf %22, %55 : vector<2x128xf32>
      %57 = vector.shape_cast %56 : vector<2x128xf32> to vector<1x2x128xf32>
      %cst_33 = arith.constant dense<0.000000e+00> : vector<1xf32>
      %58 = vector.multi_reduction <add>, %57, %cst_33 [1, 2] : vector<1x2x128xf32> to vector<1xf32>
      %59 = vector.shape_cast %58 : vector<1xf32> to vector<1x1x1xf32>
      %60 = vector.extract %59[0, 0, 0] : f32 from vector<1x1x1xf32>
      %cst_34 = arith.constant -1.000000e+30 : f32
      %61 = vector.broadcast %cst_34 : f32 to vector<2x128xf32>
      %62 = arith.select %43, %36, %61 : vector<2x128xi1>, vector<2x128xf32>
      %cst_35 = arith.constant dense<0xFF800000> : vector<2xf32>
      %63 = vector.multi_reduction <maximumf>, %62, %cst_35 [1] : vector<2x128xf32> to vector<2xf32>
      %64 = vector.shape_cast %63 : vector<2xf32> to vector<2x1xf32>
      %65 = vector.broadcast %64 : vector<2x1xf32> to vector<2x128xf32>
      %66 = arith.subf %62, %65 : vector<2x128xf32>
      %67 = math.exp %66 : vector<2x128xf32>
      %cst_36 = arith.constant dense<0.000000e+00> : vector<2xf32>
      %68 = vector.multi_reduction <add>, %67, %cst_36 [1] : vector<2x128xf32> to vector<2xf32>
      %69 = vector.shape_cast %68 : vector<2xf32> to vector<2x1xf32>
      %70 = math.log %69 : vector<2x1xf32>
      %71 = vector.broadcast %70 : vector<2x1xf32> to vector<2x128xf32>
      %72 = arith.subf %66, %71 : vector<2x128xf32>
      %73 = arith.mulf %22, %72 : vector<2x128xf32>
      %74 = vector.shape_cast %73 : vector<2x128xf32> to vector<1x2x128xf32>
      %cst_37 = arith.constant dense<0.000000e+00> : vector<1xf32>
      %75 = vector.multi_reduction <add>, %74, %cst_37 [1, 2] : vector<1x2x128xf32> to vector<1xf32>
      %76 = vector.shape_cast %75 : vector<1xf32> to vector<1x1x1xf32>
      %77 = vector.extract %76[0, 0, 0] : f32 from vector<1x1x1xf32>
      %78 = arith.addf %60, %77 : f32
      %cst_38 = arith.constant 0.000000e+00 : f32
      %79 = arith.subf %cst_38, %78 : f32
      %cst_39 = arith.constant 2.500000e-01 : f32
      %80 = arith.mulf %79, %cst_39 : f32
      %81 = vector.broadcast %80 : f32 to vector<1x8x128xf32>
      %c0_40 = arith.constant 0 : index
      %c0_41 = arith.constant 0 : index
      %c0_42 = arith.constant 0 : index
      %82 = vector.load %arg11[%c0_40, %c0_41, %c0_42] : memref<1x8x128xf32, #tpu.memory_space<vmem>>, vector<1x8x128xf32>
      tpu.vector_store %arg11[%c0_40, %c0_41, %c0_42], %81 {strides = array<i32>} : memref<1x8x128xf32, #tpu.memory_space<vmem>>, vector<1x8x128xf32>,
    } else {
    }
    return
  }
  func.func @transform_0(%arg0: i32, %arg1: i32) -> (i32, i32) {
    %c0_i32 = arith.constant 0 : i32
    %c0_i32_0 = arith.constant 0 : i32
    %c0_i32_1 = arith.constant 0 : i32
    return %c0_i32, %c0_i32_0 : i32, i32
  }
  func.func @transform_1(%arg0: i32, %arg1: i32) -> (i32, i32) {
    %c0_i32 = arith.constant 0 : i32
    return %arg0, %arg1 : i32, i32
  }
  func.func @transform_2(%arg0: i32, %arg1: i32) -> (i32, i32) {
    %c0_i32 = arith.constant 0 : i32
    %c0_i32_0 = arith.constant 0 : i32
    return %arg1, %c0_i32 : i32, i32
  }
  func.func @transform_3(%arg0: i32, %arg1: i32) -> (i32, i32) {
    %c0_i32 = arith.constant 0 : i32
    %c0_i32_0 = arith.constant 0 : i32
    %c0_i32_1 = arith.constant 0 : i32
    return %c0_i32, %c0_i32_0 : i32, i32
  }
  func.func @transform_4(%arg0: i32, %arg1: i32) -> (i32, i32) {
    %c0_i32 = arith.constant 0 : i32
    %c0_i32_0 = arith.constant 0 : i32
    %c0_i32_1 = arith.constant 0 : i32
    return %c0_i32, %c0_i32_0 : i32, i32
  }
  func.func @transform_5(%arg0: i32, %arg1: i32) -> (i32, i32) {
    %c0_i32 = arith.constant 0 : i32
    %c0_i32_0 = arith.constant 0 : i32
    %c0_i32_1 = arith.constant 0 : i32
    return %c0_i32, %c0_i32_0 : i32, i32
  }
  func.func @transform_6(%arg0: i32, %arg1: i32) -> (i32, i32) {
    %c0_i32 = arith.constant 0 : i32
    %c0_i32_0 = arith.constant 0 : i32
    return %arg0, %c0_i32 : i32, i32
  }
  func.func @transform_7(%arg0: i32, %arg1: i32) -> (i32, i32) {
    %c0_i32 = arith.constant 0 : i32
    %c0_i32_0 = arith.constant 0 : i32
    return %arg0, %c0_i32 : i32, i32
  }
  func.func @transform_8(%arg0: i32, %arg1: i32) -> (i32, i32) {
    %c0_i32 = arith.constant 0 : i32
    %c0_i32_0 = arith.constant 0 : i32
    return %arg0, %c0_i32 : i32, i32
  }
  func.func @transform_9(%arg0: i32, %arg1: i32) -> (i32, i32, i32) {
    %c0_i32 = arith.constant 0 : i32
    %c0_i32_0 = arith.constant 0 : i32
    %c0_i32_1 = arith.constant 0 : i32
    return %arg0, %c0_i32, %c0_i32_0 : i32, i32, i32
  }
}

</mosaic_0001>

<bundles_post_ra>
// kernel: tpu_custom_call.1
= control target key start
LH: loop header
LB: loop body
LE: loop exit
PB: predicated region body
PF: predicated region fallthrough
CT: control target
= control target key end

     0   :  { %15 = vsyncpa [#allocation4], 0  ;;  %s1618_s0 = inlined_call_operand.hbm [shape: f32[1,128], index: 0, kind: input, shape index: {}]   ;;  %s1619_s1 = inlined_call_operand.hbm [shape: f32[2,1024], index: 1, kind: input, shape index: {}]   ;;  %s1620_s2 = inlined_call_operand.hbm [shape: bf16[1024,128], index: 2, kind: input, shape index: {}]   ;;  %s1621_s3 = inlined_call_operand.vmem [shape: f32[1,128], index: 3, kind: input, shape index: {}]   ;;  %s1622_s4 = inlined_call_operand.hbm [shape: bf16[128,256], index: 4, kind: input, shape index: {}]   ;;  %s1623_s5 = inlined_call_operand.vmem [shape: f32[1,256], index: 5, kind: input, shape index: {}]   ;;  %s1624_s6 = inlined_call_operand.vmem [shape: f32[2,128], index: 6, kind: input, shape index: {}]   ;;  %s1625_s7 = inlined_call_operand.vmem [shape: f32[2,128], index: 7, kind: input, shape index: {}]   ;;  %s1626_s8 = inlined_call_operand.hbm [shape: f32[2,128], index: 8, kind: output, shape index: {0}]   ;;  %s1627_s9 = inlined_call_operand.hbm [shape: f32[1,8,128], index: 9, kind: output, shape index: {1}]  }
   0x1   :  { %16 = vsyncpa [#allocation7], 0 }
   0x2   :  { %17 = vsyncpa [#allocation10], 0 }
   0x3   :  { %18 = vsyncpa [#allocation5], 0 }
   0x4   :  { %19 = vsyncpa [#allocation13], 0  ;;  %s1506_s30 = smov [#allocation6]   ;;  %s1507_s11 = smov [#allocation3]  }
   0x5   :  { %s36_s10 = sshll.u32 %s1506_s30, 4  ;;  %s26_s12 = sshll.u32 %s1507_s11, 4  ;;  %s37_s10 = int_to_ptr.vmem [resolvable:$true] %s36_s10  ;;  %s27_s12 = int_to_ptr.vmem [resolvable:$true] %s26_s12 }
   0x6   :  { %s1384_s13 = scalar_lea.vmem %s37_s10, 256  ;;  %p1389_p1 = scmp.lt.s32.totalorder %s37_s10, %s37_s10 }
   0x7   :  { %p1385_p0 = scmp.ne.s32.totalorder %s37_s10, %s1384_s13  ;;  %p1390_p2 = scmp.lt.s32.totalorder %s1384_s13, %s1384_s13 }
   0x9   :  { %p1391_p3 = por %p1390_p2, %p1389_p1 }
   0xb   :  { %p1392_p4 = pnand %p1391_p3, %p1385_p0 }
   0xd   :  { %1395 = shalt.err (!%p1392_p4)
}
   0xe   :  { %39 = dma.hbm_to_vmem [thread:$0]  %s1619_s1, 256, %s37_s10, [#allocation7]  }
   0xf   :  { %s1404_s16 = scalar_lea.vmem %s27_s12, 16  ;;  %s1408_s17 = scalar_lea.vmem %s27_s12, 32 }
  0x10   :  { %p1405_p5 = scmp.ne.s32.totalorder %s27_s12, %s1404_s16  ;;  %p1409_p6 = scmp.lt.s32.totalorder %s27_s12, %s27_s12 }
  0x11   :  { %p1410_p7 = scmp.lt.s32.totalorder %s1408_s17, %s1404_s16 }
  0x13   :  { %p1411_p8 = por %p1410_p7, %p1409_p6 }
  0x15   :  { %p1412_p9 = pnand %p1411_p8, %p1405_p5 }
  0x17   :  { %1415 = shalt.err (!%p1412_p9)
}
  0x18   :  { %29 = dma.hbm_to_vmem [thread:$0]  %s1618_s0, 16, %s27_s12, [#allocation4]  }
  0x19   :  { %s1508_s20 = smov [#allocation8]  }
  0x1a   :  { %s45_s21 = sshll.u32 %s1508_s20, 4  ;;  %s46_s21 = int_to_ptr.vmem [resolvable:$true] %s45_s21 }
  0x1b   :  { %s1424_s22 = scalar_lea.vmem %s46_s21, 8192  ;;  %p1429_p11 = scmp.lt.s32.totalorder %s46_s21, %s46_s21 }
  0x1c   :  { %p1425_p10 = scmp.ne.s32.totalorder %s46_s21, %s1424_s22  ;;  %p1430_p12 = scmp.lt.s32.totalorder %s1424_s22, %s1424_s22 }
  0x1e   :  { %p1431_p13 = por %p1430_p12, %p1429_p11 }
  0x20   :  { %p1432_p0 = pnand %p1431_p13, %p1425_p10 }
  0x22   :  { %1435 = shalt.err (!%p1432_p0)
}
  0x23   :  { %s1509_s1 = smov 64   ;;  %s1510_s23 = smov 4  }
  0x24   :  { %51 = dma.hbm_to_vmem [thread:$0]  %s1620_s2, 8192, %s46_s21, [#allocation7], %s1509_s1, %s1509_s1, %s1510_s23  }
  0x25   :  { %s1511_s26 = smov [#allocation9]  }
  0x26   :  { %s59_s27 = sshll.u32 %s1511_s26, 4  ;;  %s60_s27 = int_to_ptr.vmem [resolvable:$true] %s59_s27 }
  0x27   :  { %s1444_s0 = scalar_lea.vmem %s60_s27, 2048  ;;  %p1449_p2 = scmp.lt.s32.totalorder %s60_s27, %s60_s27 }
  0x28   :  { %p1445_p1 = scmp.ne.s32.totalorder %s60_s27, %s1444_s0  ;;  %p1450_p3 = scmp.lt.s32.totalorder %s1444_s0, %s1444_s0 }
  0x2a   :  { %p1451_p4 = por %p1450_p3, %p1449_p2 }
  0x2c   :  { %p1452_p5 = pnand %p1451_p4, %p1445_p1 }
  0x2e   :  { %1455 = shalt.err (!%p1452_p5)
}
  0x2f   :  { %s1512_s28 = smov 128   ;;  %s1513_s29 = smov 8  }
  0x30   :  { %65 = dma.hbm_to_vmem [thread:$0]  %s1622_s4, 2048, %s60_s27, [#allocation10], %s1512_s28, %s1512_s28, %s1513_s29  }
  0x31   :  { %1496 = dma.done.wait [#allocation4], 16  }
  0x32   :  { %1497 = vsyncadd [#allocation4], 4294967280 }
  0x33   :  { %1498 = dma.done.wait [#allocation7], 8448  }
  0x34   :  { %1499 = vsyncadd [#allocation7], 4294958848 }
  0x35   :  { %1500 = dma.done.wait [#allocation10], 2048  }
  0x36   :  { %1501 = vsyncadd [#allocation10], 4294965248  ;;  %v1278_v0 = vld [vmem:[#allocation8 + $0x78] sm:$0xff]   ;;  %v1282_v4 = vld [vmem:[#allocation8 + $0x70] sm:$0xff]   ;;  %v1514_v22 = vmov 1983009808   ;;  %v99_v24 = vlaneseq }
  0x37   :  { %v1279_v1 = vld [vmem:[#allocation8 + $0xf8] sm:$0xff]   ;;  %1173 = vmatprep.subr.bf16.mxu0 %v1278_v0  ;;  %v1283_v5 = vld [vmem:[#allocation8 + $0xf0] sm:$0xff]   ;;  %v1286_v8 = vld [vmem:[#allocation8 + $0x68] sm:$0xff]   ;;  %v97_v23 = vunpack.c.l.s4 %v1514_v22  ;;  %vm1008_vm1 = vcmask 1041408  }
  0x38   :  { %v1280_v2 = vld [vmem:[#allocation8 + $0x38] sm:$0xff]   ;;  %1195 = vmatprep.subr.bf16.mxu1 %v1279_v1  ;;  %v1284_v6 = vld [vmem:[#allocation8 + $0x30] sm:$0xff]   ;;  %v1287_v9 = vld [vmem:[#allocation8 + $0xe8] sm:$0xff]   ;;  %v1582_v30 = vshrl.u32 %v99_v24, 7 }
  0x39   :  { %v1281_v3 = vld [vmem:[#allocation8 + $0xb8] sm:$0xff]   ;;  %1174 = vmatpush3.bf16.msra.mxu0 %v1280_v2  ;;  %v1285_v7 = vld [vmem:[#allocation8 + $0xb0] sm:$0xff]   ;;  %v1288_v10 = vld [vmem:[#allocation8 + $0x28] sm:$0xff]   ;;  %v98_v29 = vunpack.c.0.s8 %v97_v23 }
  0x3a   :  { %1196 = vmatpush3.bf16.msra.mxu1 %v1281_v3  ;;  %1175 = vmatprep.subr.bf16.mxu0 %v1282_v4  ;;  %v1289_v11 = vld [vmem:[#allocation8 + $0xa8] sm:$0xff]   ;;  %v1290_v12 = vld [vmem:[#allocation8 + $0x60] sm:$0xff]   ;;  %v1294_v16 = vld [vmem:[#allocation8 + $0x58] sm:$0xff]  }
  0x3b   :  { %1197 = vmatprep.subr.bf16.mxu1 %v1283_v5  ;;  %v1291_v13 = vld [vmem:[#allocation8 + $0xe0] sm:$0xff]   ;;  %v1295_v17 = vld [vmem:[#allocation8 + $0xd8] sm:$0xff]   ;;  %v1298_v20 = vld [vmem:[#allocation8 + $0x50] sm:$0xff]   ;;  %v1585_v35 = vsub.s32 %v98_v29, %v1582_v30 }
  0x3c   :  { %v1292_v14 = vld [vmem:[#allocation8 + $0x20] sm:$0xff]   ;;  %v1296_v18 = vld [vmem:[#allocation8 + $0x18] sm:$0xff]   ;;  %v1299_v21 = vld [vmem:[#allocation8 + $0xd0] sm:$0xff]  }
  0x3d   :  { %1176 = vmatpush3.bf16.msra.mxu0 %v1284_v6  ;;  %v1293_v15 = vld [vmem:[#allocation8 + $0xa0] sm:$0xff]   ;;  %v1297_v19 = vld [vmem:[#allocation8 + $0x98] sm:$0xff]   ;;  %v1300_v25 = vld [vmem:[#allocation8 + $0x10] sm:$0xff]  }
  0x3e   :  { %1198 = vmatpush3.bf16.msra.mxu1 %v1285_v7  ;;  %1177 = vmatprep.subr.bf16.mxu0 %v1286_v8  ;;  %v1301_v26 = vld [vmem:[#allocation8 + $0x90] sm:$0xff]   ;;  %v1302_v27 = vld [vmem:[#allocation8 + $0x48] sm:$0xff]   ;;  %v1306_v33 = vld [vmem:[#allocation8 + $0x40] sm:$0xff]  }
  0x3f   :  { %1199 = vmatprep.subr.bf16.mxu1 %v1287_v9  ;;  %v1303_v28 = vld [vmem:[#allocation8 + $0xc8] sm:$0xff]   ;;  %v1307_v34 = vld [vmem:[#allocation8 + $0xc0] sm:$0xff]   ;;  %v91_v38 = vld [vmem:[#allocation6] sm:$0xff] }
  0x40   :  { %v1304_v31 = vld [vmem:[#allocation8 + $0x8] sm:$0xff]   ;;  %v1308_v36 = vld [vmem:[#allocation8] sm:$0xff]   ;;  %v102_v39 = vrot.slane %v91_v38, %v1585_v35  ;;  %v95_v40 = vcombine.high %v91_v38, %v91_v38  ;;  %v1311_v41 = vld [vmem:[#allocation8 + $0x178] sm:$0xff]  }
  0x41   :  { %1178 = vmatpush3.bf16.msra.mxu0 %v1288_v10  ;;  %v1305_v32 = vld [vmem:[#allocation8 + $0x88] sm:$0xff]   ;;  %v1309_v37 = vld [vmem:[#allocation8 + $0x80] sm:$0xff]   ;;  %v1312_v42 = vld [vmem:[#allocation8 + $0x1f8] sm:$0xff]  }
  0x42   :  { %1200 = vmatpush3.bf16.msra.mxu1 %v1289_v11  ;;  %1179 = vmatprep.subr.bf16.mxu0 %v1290_v12  ;;  %v110_v43 = vcombine.high %v102_v39, %v102_v39  ;;  %v109_v44 = vrot.slane %v95_v40, %v1585_v35  ;;  %v137_v45 = vpack.c.bf16 %v102_v39, %v102_v39  ;;  %v1313_v46 = vld [vmem:[#allocation8 + $0x138] sm:$0xff]   ;;  %v1315_v51 = vld [vmem:[#allocation8 + $0x170] sm:$0xff]   ;;  %v1319_v56 = vld [vmem:[#allocation8 + $0x168] sm:$0xff]  }
  0x43   :  { %1201 = vmatprep.subr.bf16.mxu1 %v1291_v13  ;;  %v1314_v49 = vld [vmem:[#allocation8 + $0x1b8] sm:$0xff]   ;;  %v1316_v53 = vld [vmem:[#allocation8 + $0x1f0] sm:$0xff]   ;;  %v1320_v57 = vld [vmem:[#allocation8 + $0x1e8] sm:$0xff]  }
  0x44   :  { %v138_v47 = vpack.c.bf16 %v110_v43, %v110_v43  ;;  %v111_v48 = vcombine.high %v109_v44, %v109_v44  ;;  %v139_v50 = vpack.c.bf16 %v109_v44, %v109_v44  ;;  %v1317_v54 = vld [vmem:[#allocation8 + $0x130] sm:$0xff]   ;;  %v1321_v58 = vld [vmem:[#allocation8 + $0x128] sm:$0xff]   ;;  %v1323_v60 = vld [vmem:[#allocation8 + $0x160] sm:$0xff]  }
  0x45   :  { %1180 = vmatpush3.bf16.msra.mxu0 %v1292_v14  ;;  %v1318_v55 = vld [vmem:[#allocation8 + $0x1b0] sm:$0xff]   ;;  %v1322_v59 = vld [vmem:[#allocation8 + $0x1a8] sm:$0xff]   ;;  %v1324_v61 = vld [vmem:[#allocation8 + $0x1e0] sm:$0xff]  }
  0x46   :  { %1202 = vmatpush3.bf16.msra.mxu1 %v1293_v15  ;;  %1181 = vmatprep.subr.bf16.mxu0 %v1294_v16  ;;  %v140_v52 = vpack.c.bf16 %v111_v48, %v111_v48  ;;  %v1325_v62 = vld [vmem:[#allocation8 + $0x120] sm:$0xff]   ;;  %v1327_v0 = vld [vmem:[#allocation8 + $0x158] sm:$0xff]   ;;  %v1331_v4 = vld [vmem:[#allocation8 + $0x150] sm:$0xff]  }
  0x47   :  { %1203 = vmatprep.subr.bf16.mxu1 %v1295_v17  ;;  %689 = vmatprep.mubr.bf16.mxu0 %v138_v47  ;;  %v1326_v63 = vld [vmem:[#allocation8 + $0x1a0] sm:$0xff]   ;;  %v1328_v1 = vld [vmem:[#allocation8 + $0x1d8] sm:$0xff]   ;;  %v1332_v5 = vld [vmem:[#allocation8 + $0x1d0] sm:$0xff]  }
  0x48   :  { %729 = vmatprep.mubr.bf16.mxu1 %v140_v52  ;;  %v1329_v2 = vld [vmem:[#allocation8 + $0x118] sm:$0xff]   ;;  %v1333_v6 = vld [vmem:[#allocation8 + $0x110] sm:$0xff]   ;;  %v1335_v8 = vld [vmem:[#allocation8 + $0x148] sm:$0xff]  }
  0x49   :  { %1182 = vmatpush3.bf16.msra.mxu0 %v1296_v18  ;;  %v1330_v3 = vld [vmem:[#allocation8 + $0x198] sm:$0xff]   ;;  %v1334_v7 = vld [vmem:[#allocation8 + $0x190] sm:$0xff]   ;;  %v1336_v9 = vld [vmem:[#allocation8 + $0x1c8] sm:$0xff]  }
  0x4a   :  { %1204 = vmatpush3.bf16.msra.mxu1 %v1297_v19  ;;  %1183 = vmatprep.subr.bf16.mxu0 %v1298_v20  ;;  %v1337_v10 = vld [vmem:[#allocation8 + $0x108] sm:$0xff]   ;;  %v1339_v12 = vld [vmem:[#allocation8 + $0x140] sm:$0xff]   ;;  %v92_v15 = vld [vmem:[#allocation6 + $0x8] sm:$0xff] }
  0x4b   :  { %1205 = vmatprep.subr.bf16.mxu1 %v1299_v21  ;;  %v1338_v11 = vld [vmem:[#allocation8 + $0x188] sm:$0xff]   ;;  %v1340_v13 = vld [vmem:[#allocation8 + $0x1c0] sm:$0xff]   ;;  %v119_v17 = vrot.slane %v92_v15, %v1585_v35  ;;  %v112_v18 = vcombine.high %v92_v15, %v92_v15  ;;  %v1356_v38 = vld [vmem:[#allocation9 + $0x30] ss:$8 sps:$4 sm:$0xff]   ;;  %v1005_v15 = vand.u32 127, %v99_v24 }
  0x4c   :  { %v1341_v14 = vld [vmem:[#allocation8 + $0x100] sm:$0xff]   ;;  %v1362_v43 = vld [vmem:[#allocation9 + $0x10] ss:$8 sps:$4 sm:$0xff]  }
  0x4d   :  { %1184 = vmatpush3.bf16.msra.mxu0 %v1300_v25  ;;  %v1342_v16 = vld [vmem:[#allocation8 + $0x180] sm:$0xff]   ;;  %v127_v19 = vcombine.high %v119_v17, %v119_v17  ;;  %v126_v20 = vrot.slane %v112_v18, %v1585_v35  ;;  %v141_v21 = vpack.c.bf16 %v119_v17, %v119_v17  ;;  %vm1006_vm0 = vcmp.lt.s32.totalorder %v1005_v15, 16 }
  0x4e   :  { %1206 = vmatpush3.bf16.msra.mxu1 %v1301_v26  ;;  %1185 = vmatprep.subr.bf16.mxu0 %v1302_v27  ;;  %v1344_v27 = vld [vmem:[#allocation9 + $0x70] ss:$8 sps:$4 sm:$0xff]   ;;  %v1349_v29 = vld [vmem:[#allocation9 + $0x64] ss:$8 sps:$4 sm:$0xff]   ;;  %v1359_v40 = vld [vmem:[#allocation9 + $0x20] ss:$8 sps:$4 sm:$0xff]  }
  0x4f   :  { %1207 = vmatprep.subr.bf16.mxu1 %v1303_v28  ;;  %v142_v22 = vpack.c.bf16 %v127_v19, %v127_v19  ;;  %v128_v23 = vcombine.high %v126_v20, %v126_v20  ;;  %v143_v25 = vpack.c.bf16 %v126_v20, %v126_v20  ;;  %v1346_v28 = vld [vmem:[#allocation9 + $0x74] ss:$8 sps:$4 sm:$0xff]   ;;  %v1355_v35 = vld [vmem:[#allocation9 + $0x44] ss:$8 sps:$4 sm:$0xff]  }
  0x50   :  { %v1361_v39 = vld [vmem:[#allocation9 + $0x24] ss:$8 sps:$4 sm:$0xff]  }
  0x51   :  { %1186 = vmatpush3.bf16.msra.mxu0 %v1304_v31  ;;  %v144_v26 = vpack.c.bf16 %v128_v23, %v128_v23  ;;  %v1347_v31 = vld [vmem:[#allocation9 + $0x60] ss:$8 sps:$4 sm:$0xff]   ;;  %v1367_v44 = vld [vmem:[#allocation9 + $0x4] ss:$8 sps:$4 sm:$0xff]  }
  0x52   :  { %1208 = vmatpush3.bf16.msra.mxu1 %v1305_v32  ;;  %1187 = vmatprep.subr.bf16.mxu0 %v1306_v33  ;;  %v1352_v32 = vld [vmem:[#allocation9 + $0x54] ss:$8 sps:$4 sm:$0xff]   ;;  %v1350_v33 = vld [vmem:[#allocation9 + $0x50] ss:$8 sps:$4 sm:$0xff]  }
  0x53   :  { %1209 = vmatprep.subr.bf16.mxu1 %v1307_v34  ;;  %v1515_v34 = vmov 0.0  }
  0x54   :  { %89 = vst [vmem:[#allocation2] sm:$0x3] %v1515_v34 }
  0x55   :  { %1188 = vmatpush3.bf16.msra.mxu0 %v1308_v36  ;;  %v1353_v36 = vld [vmem:[#allocation9 + $0x40] ss:$8 sps:$4 sm:$0xff]  }
  0x56   :  { %1210 = vmatpush3.bf16.msra.mxu1 %v1309_v37  ;;  %1217 = vmatprep.subr.bf16.mxu0 %v1311_v41  ;;  %v1358_v37 = vld [vmem:[#allocation9 + $0x34] ss:$8 sps:$4 sm:$0xff]  }
  0x57   :  { %1239 = vmatprep.subr.bf16.mxu1 %v1312_v42  ;;  %v1364_v41 = vld [vmem:[#allocation9 + $0x14] ss:$8 sps:$4 sm:$0xff]   ;;  %v1516_v42 = vmov 0  }
  0x58   :  { %690 = vmatmul.mubr.bf16.vlgmr.msra.gmra.mxu0 %v137_v45  ;;  %v1365_v45 = vld [vmem:[#allocation9] ss:$8 sps:$4 sm:$0xff]  }
  0x59   :  { %1218 = vmatpush3.bf16.msra.mxu0 %v1313_v46  ;;  %730 = vmatmul.mubr.bf16.vlgmr.msra.gmra.mxu1 %v139_v50 }
  0x5a   :  { %1219 = vmatprep.subr.bf16.mxu0 %v1315_v51  ;;  %1240 = vmatpush3.bf16.msra.mxu1 %v1314_v49 }
  0x5b   :  { %1241 = vmatprep.subr.bf16.mxu1 %v1316_v53  ;;  %769 = vmatprep.mubr.bf16.mxu0 %v142_v22 }
  0x5c   :  { %809 = vmatprep.mubr.bf16.mxu1 %v144_v26 }
  0x5d   :  { %1220 = vmatpush3.bf16.msra.mxu0 %v1317_v54 }
  0x5e   :  { %1221 = vmatprep.subr.bf16.mxu0 %v1319_v56  ;;  %1242 = vmatpush3.bf16.msra.mxu1 %v1318_v55 }
  0x5f   :  { %1243 = vmatprep.subr.bf16.mxu1 %v1320_v57 }
  0x61   :  { %1222 = vmatpush3.bf16.msra.mxu0 %v1321_v58 }
  0x62   :  { %1223 = vmatprep.subr.bf16.mxu0 %v1323_v60  ;;  %1244 = vmatpush3.bf16.msra.mxu1 %v1322_v59 }
  0x63   :  { %1245 = vmatprep.subr.bf16.mxu1 %v1324_v61 }
  0x65   :  { %1224 = vmatpush3.bf16.msra.mxu0 %v1325_v62 }
  0x66   :  { %1225 = vmatprep.subr.bf16.mxu0 %v1327_v0  ;;  %1246 = vmatpush3.bf16.msra.mxu1 %v1326_v63 }
  0x67   :  { %1247 = vmatprep.subr.bf16.mxu1 %v1328_v1  ;;  %v90_v1 = vld [vmem:[#allocation2] sm:$0x3] }
  0x69   :  { %1226 = vmatpush3.bf16.msra.mxu0 %v1329_v2 }
  0x6a   :  { %1227 = vmatprep.subr.bf16.mxu0 %v1331_v4  ;;  %1248 = vmatpush3.bf16.msra.mxu1 %v1330_v3 }
  0x6b   :  { %1249 = vmatprep.subr.bf16.mxu1 %v1332_v5 }
  0x6d   :  { %1228 = vmatpush3.bf16.msra.mxu0 %v1333_v6 }
  0x6e   :  { %1229 = vmatprep.subr.bf16.mxu0 %v1335_v8  ;;  %1250 = vmatpush3.bf16.msra.mxu1 %v1334_v7  ;;  %v1156_v7 = vld [vmem:[%s1621_s3] ss:$0 sm:$0xff] }
  0x6f   :  { %1251 = vmatprep.subr.bf16.mxu1 %v1336_v9 }
  0x71   :  { %1230 = vmatpush3.bf16.msra.mxu0 %v1337_v10 }
  0x72   :  { %1231 = vmatprep.subr.bf16.mxu0 %v1339_v12  ;;  %1252 = vmatpush3.bf16.msra.mxu1 %v1338_v11  ;;  %v827_v12 = vsub.s32 0, %v1582_v30 }
  0x73   :  { %1253 = vmatprep.subr.bf16.mxu1 %v1340_v13  ;;  %v868_v13 = vld [vmem:[%s1623_s5] sm:$0x3] }
  0x75   :  { %1232 = vmatpush3.bf16.msra.mxu0 %v1341_v14  ;;  %v876_v14 = vsub.s32 1, %v1582_v30 }
  0x76   :  { %1254 = vmatpush3.bf16.msra.mxu1 %v1342_v16  ;;  %960 = vmatprep.subr.bf16.mxu0 %v1346_v28  ;;  %v873_v16 = vrot.slane %v868_v13, %v827_v12 }
  0x77   :  { %v877_v17 = vrot.slane %v868_v13, %v876_v14 }
  0x78   :  { %770 = vmatmul.mubr.bf16.vlgmr.msra.gmra.mxu0 %v141_v21 }
  0x79   :  { %810 = vmatmul.mubr.bf16.vlgmr.msra.gmra.mxu1 %v143_v25  ;;  %961 = vmatpush1.bf16.msra.mxu0 %v1344_v27 }
  0x7a   :  { %962 = vmatprep.subr.bf16.mxu0 %v1349_v29  ;;  %992 = vmatprep.mubr.bf16.mxu0 %v1516_v42 }
  0x7d   :  { %963 = vmatpush1.bf16.msra.mxu0 %v1347_v31 }
  0x7e   :  { %964 = vmatprep.subr.bf16.mxu0 %v1352_v32 }
  0x81   :  { %965 = vmatpush1.bf16.msra.mxu0 %v1350_v33 }
  0x82   :  { %966 = vmatprep.subr.bf16.mxu0 %v1355_v35 }
  0x85   :  { %967 = vmatpush1.bf16.msra.mxu0 %v1353_v36 }
  0x86   :  { %968 = vmatprep.subr.bf16.mxu0 %v1358_v37 }
  0x89   :  { %969 = vmatpush1.bf16.msra.mxu0 %v1356_v38 }
  0x8a   :  { %970 = vmatprep.subr.bf16.mxu0 %v1361_v39 }
  0x8d   :  { %971 = vmatpush1.bf16.msra.mxu0 %v1359_v40 }
  0x8e   :  { %972 = vmatprep.subr.bf16.mxu0 %v1364_v41  ;;  %v822_v41 = vld [vmem:[#allocation3] sm:$0x1] }
  0x8f   :  { %v831_v42 = vsub.f32 1.0, %v822_v41 }
  0x91   :  { %973 = vmatpush1.bf16.msra.mxu0 %v1362_v43 }
  0x92   :  { %974 = vmatprep.subr.bf16.mxu0 %v1367_v44  ;;  %v828_v44 = vrot.slane %v822_v41, %v827_v12 }
  0x95   :  { %975 = vmatpush1.bf16.msra.mxu0 %v1365_v45  ;;  %v837_v45 = vrot.slane %v831_v42, %v827_v12 }
 0x118   :  { %v1189_v46 = vpop.f32.mrf.mxu0 }
 0x119   :  { %v1211_v47 = vpop.f32.mrf.mxu1 }
 0x11a   :  { %v1190_v48 = vpop.f32.mrf.mxu0 }
 0x11b   :  { %v1212_v49 = vpop.f32.mrf.mxu1  ;;  %v1191_v54 = vadd.f32 %v1190_v48, %v1189_v46  ;;  %v823_v46 = vld [vmem:[%s1624_s6] sm:$0x3]  ;;  %s1517_s6 = smov [#allocation11]  }
 0x11c   :  { %v1192_v50 = vpop.f32.mrf.mxu0  ;;  %v1213_v55 = vadd.f32 %v1212_v49, %v1211_v47  ;;  %v832_v47 = vld [vmem:[%s1625_s7] sm:$0x3]  ;;  %v830_v48 = vmul.f32 %v828_v44, %v823_v46  ;;  %s1067_s15 = sshll.u32 %s1517_s6, 4  ;;  %s1068_s15 = int_to_ptr.vmem [resolvable:$true] %s1067_s15 }
 0x11d   :  { %v1214_v51 = vpop.f32.mrf.mxu1  ;;  %v839_v49 = vmul.f32 %v837_v45, %v832_v47  ;;  %s1456_s7 = scalar_lea.vmem %s1068_s15, 32  ;;  %p1461_p7 = scmp.lt.s32.totalorder %s1068_s15, %s1068_s15 }
 0x11e   :  { %v1193_v52 = vpop.f32.mrf.mxu0  ;;  %v732_v59 = vadd.f32 %v1213_v55, %v1191_v54  ;;  %p1457_p6 = scmp.ne.s32.totalorder %s1068_s15, %s1456_s7  ;;  %p1462_p8 = scmp.lt.s32.totalorder %s1456_s7, %s1456_s7 }
 0x11f   :  { %v1215_v53 = vpop.f32.mrf.mxu1  ;;  %v840_v52 = vadd.f32 %v839_v49, %v830_v48 }
 0x120   :  { %p1463_p9 = por %p1462_p8, %p1461_p7 }
 0x122   :  { %p1464_p10 = pnand %p1463_p9, %p1457_p6 }
 0x138   :  { %v1233_v56 = vpop.f32.mrf.mxu0 }
 0x139   :  { %v1255_v57 = vpop.f32.mrf.mxu1 }
 0x13a   :  { %v1234_v58 = vpop.f32.mrf.mxu0 }
 0x13b   :  { %v1235_v60 = vadd.f32 %v1234_v58, %v1233_v56  ;;  %v1256_v61 = vpop.f32.mrf.mxu1 }
 0x13c   :  { %v1236_v62 = vpop.f32.mrf.mxu0  ;;  %v1257_v0 = vadd.f32 %v1256_v61, %v1255_v57 }
 0x13d   :  { %v772_v63 = vadd.f32 %v1235_v60, %v732_v59  ;;  %v1258_v2 = vpop.f32.mrf.mxu1 }
 0x13e   :  { %v1237_v3 = vpop.f32.mrf.mxu0 }
 0x13f   :  { %v812_v4 = vadd.f32 %v1257_v0, %v772_v63  ;;  %v1259_v5 = vpop.f32.mrf.mxu1 }
 0x141   :  { %v817_v6 = vadd.f32 %v812_v4, %v90_v1 }
 0x143   :  { %818 = vst [vmem:[#allocation2] sm:$0x3] %v817_v6 }
 0x14a   :  { %v841_v8 = vld [vmem:[#allocation2] sm:$0x3] }
 0x14b   :  { %v849_v9 = vadd.f32 %v1156_v7, %v841_v8 }
 0x14d   :  { %v850_v10 = vmax.f32 %v849_v9, 0.0 }
 0x14f   :  { %v851_v11 = vpack.c.bf16 %v850_v10, %v850_v10 }
 0x151   :  { %993 = vmatmul.mubr.bf16.vlgmr.msra.gmra.mxu0 %v851_v11 }
 0x211   :  { %v994_v18 = vpop.f32.mrf.mxu0 }
 0x212   :  { %v995_v19 = vadd.f32 %v994_v18, %v873_v16 }
 0x213   :  { %v996_v20 = vpop.f32.mrf.mxu0 }
 0x214   :  { %v997_v21 = vadd.f32 %v996_v20, %v877_v17  ;;  %v1007_v22 = vsel %vm1006_vm0, %v995_v19, -1e+30 }
 0x215   :  { %v998_v23 = vpop.f32.mrf.mxu0  ;;  %v1009_v25 = vsel %vm1008_vm1, %v1007_v22, -inf }
 0x216   :  { %v1001_v26 = vadd.f32 %v997_v21, %v995_v19  ;;  %1010 = vmax.xlane.f32.xlu0 %v1009_v25  ;;  %v1032_v27 = vsel %vm1006_vm0, %v997_v21, -1e+30 }
 0x217   :  { %v999_v28 = vpop.f32.mrf.mxu0  ;;  %v1033_v30 = vsel %vm1008_vm1, %v1032_v27, -inf }
 0x218   :  { %v1002_v29 = vmul.f32 0.5, %v1001_v26 }
 0x21a   :  { %1003 = vst [vmem:[#allocation11] sm:$0x3] %v1002_v29  ;;  %1034 = vmax.xlane.f32.xlu0 %v1033_v30 }
 0x29f   :  { %v1011_v24 = vpop.xlane.xlu0 %1010 }
 0x2a0   :  { %v1012_v31 = vsub.f32 %v1007_v22, %v1011_v24 }
 0x2a2   :  { %v1013_v32 = vmul.f32 1.442695, %v1012_v31 }
 0x2a3   :  { %v1035_v33 = vpop.xlane.xlu0 %1034 }
 0x2a4   :  { %1368 = vpow2.f32 %v1013_v32  ;;  %v1036_v34 = vsub.f32 %v1032_v27, %v1035_v33 }
 0x2a6   :  { %v1037_v35 = vmul.f32 1.442695, %v1036_v34 }
 0x2a8   :  { %1370 = vpow2.f32 %v1037_v35 }
 0x2b1   :  { %v1369_v36 = vpop.eup %1368 }
 0x2b2   :  { %v1015_v37 = vsel %vm1008_vm1, %v1369_v36, 0.0 }
 0x2b3   :  { %1016 = vadd.xlane.f32.xlu1 %v1015_v37 }
 0x2b5   :  { %v1371_v38 = vpop.eup %1370 }
 0x2b6   :  { %v1039_v39 = vsel %vm1008_vm1, %v1371_v38, 0.0 }
 0x2b7   :  { %1040 = vadd.xlane.f32.xlu1 %v1039_v39 }
 0x33c   :  { %v1017_v40 = vpop.xlane.xlu1 %1016 }
 0x33d   :  { %1372 = vlog2.f32 %v1017_v40 }
 0x340   :  { %v1041_v43 = vpop.xlane.xlu1 %1040 }
 0x341   :  { %1374 = vlog2.f32 %v1041_v43 }
 0x34a   :  { %v1373_v50 = vpop.eup %1372 }
 0x34b   :  { %v1019_v51 = vmul.f32 0.6931472, %v1373_v50 }
 0x34d   :  { %v1020_v53 = vsub.f32 %v1012_v31, %v1019_v51 }
 0x34e   :  { %v1375_v54 = vpop.eup %1374 }
 0x34f   :  { %v1043_v55 = vmul.f32 0.6931472, %v1375_v54  ;;  %v1021_v56 = vmul.f32 %v1020_v53, %v840_v52 }
 0x351   :  { %v1022_v57 = vsel %vm1008_vm1, %v1021_v56, 0.0  ;;  %v1044_v58 = vsub.f32 %v1036_v34, %v1043_v55 }
 0x352   :  { %1023 = vadd.xlane.f32.xlu0 %v1022_v57 }
 0x353   :  { %v1045_v59 = vmul.f32 %v1044_v58, %v840_v52 }
 0x355   :  { %v1046_v60 = vsel %vm1008_vm1, %v1045_v59, 0.0 }
 0x356   :  { %1047 = vadd.xlane.f32.xlu1 %v1046_v60 }
 0x357   :  { %1467 = shalt.err (!%p1464_p10)
}
 0x358   :  { %1070 = dma.vmem_to_hbm [thread:$0]  %s1068_s15, 32, %s1626_s8, [#allocation5]  }
 0x359   :  { %s1518_s21 = smov [#allocation12]  }
 0x35a   :  { %s1077_s22 = sshll.u32 %s1518_s21, 4  ;;  %s1078_s22 = int_to_ptr.vmem [resolvable:$true] %s1077_s22 }
 0x35b   :  { %s1476_s23 = scalar_lea.vmem %s1078_s22, 128  ;;  %p1481_p12 = scmp.lt.s32.totalorder %s1078_s22, %s1078_s22 }
 0x35c   :  { %p1477_p11 = scmp.ne.s32.totalorder %s1078_s22, %s1476_s23  ;;  %p1482_p13 = scmp.lt.s32.totalorder %s1476_s23, %s1476_s23 }
 0x35e   :  { %p1483_p0 = por %p1482_p13, %p1481_p12 }
 0x360   :  { %p1484_p1 = pnand %p1483_p0, %p1477_p11 }
 0x3db   :  { %v1024_v61 = vpop.xlane.xlu0 %1023 }
 0x3dc   :  { %v1025_v62 = vrot.slane %v1024_v61, 4 }
 0x3de   :  { %v1026_v63 = vadd.f32 %v1025_v62, %v1024_v61 }
 0x3df   :  { %v1048_v0 = vpop.xlane.xlu1 %1047 }
 0x3e0   :  { %v1027_v1 = vrot.slane %v1026_v63, 2  ;;  %v1049_v2 = vrot.slane %v1048_v0, 4 }
 0x3e2   :  { %v1050_v3 = vadd.f32 %v1049_v2, %v1048_v0  ;;  %v1028_v4 = vadd.f32 %v1027_v1, %v1026_v63 }
 0x3e4   :  { %v1051_v5 = vrot.slane %v1050_v3, 2  ;;  %v1029_v6 = vrot.slane %v1028_v4, 1 }
 0x3e6   :  { %v1052_v7 = vadd.f32 %v1051_v5, %v1050_v3  ;;  %v1030_v8 = vadd.f32 %v1029_v6, %v1028_v4 }
 0x3e8   :  { %1261 = vpush %v1030_v8  ;;  %v1053_v9 = vrot.slane %v1052_v7, 1 }
 0x3ea   :  { %v1054_v10 = vadd.f32 %v1053_v9, %v1052_v7 }
 0x3ec   :  { %1263 = vpush %v1054_v10 }
 0x419   :  { %s1262_s18 = spop %1261 }
 0x41d   :  { %s1264_s19 = spop %1263 }
 0x41e   :  { %s1056_s20 = sadd.f32 %s1264_s19, %s1262_s18 }
 0x420   :  { %s1057_s8 = ssub.f32 0.0, %s1056_s20 }
 0x422   :  { %s1058_s1 = smul.f32 0.25, %s1057_s8 }
 0x424   :  { %v1059_v11 = vstv %s1058_s1 }
 0x425   :  { %1060 = vst [vmem:[#allocation12] sm:$0xff] %v1059_v11 }
 0x426   :  { %1487 = shalt.err (!%p1484_p1)
}
 0x427   :  { %1080 = dma.vmem_to_hbm [thread:$0]  %s1078_s22, 128, %s1627_s9, [#allocation13]  }
 0x428   :  { %1502 = dma.done.wait [#allocation5], 32  }
 0x429   :  { %1503 = vsyncadd [#allocation5], 4294967264 }
 0x42a   :  { %1504 = dma.done.wait [#allocation13], 128  }
 0x42b   :  { %1505 = vsyncadd [#allocation13], 4294967168 }
 0x42c   :  { %1087 = vsyncpa [#allocation4], 1 }
 0x42d   :  { %1088 = vsyncpa [#allocation7], 1 }
 0x42e   :  { %1089 = vsyncpa [#allocation10], 1 }
 0x42f   :  { %1090 = vsyncpa [#allocation5], 1 }
 0x430   :  { %1091 = vsyncpa [#allocation13], 1 }

// kernel: tpu_custom_call.1
= control target key start
LH: loop header
LB: loop body
LE: loop exit
PB: predicated region body
PF: predicated region fallthrough
CT: control target
= control target key end

     0   :  { %15 = vsyncpa [#allocation4], 0  ;;  %s1618_s0 = inlined_call_operand.hbm [shape: f32[1,128], index: 0, kind: input, shape index: {}]   ;;  %s1619_s1 = inlined_call_operand.hbm [shape: f32[2,1024], index: 1, kind: input, shape index: {}]   ;;  %s1620_s2 = inlined_call_operand.hbm [shape: bf16[1024,128], index: 2, kind: input, shape index: {}]   ;;  %s1621_s3 = inlined_call_operand.vmem [shape: f32[1,128], index: 3, kind: input, shape index: {}]   ;;  %s1622_s4 = inlined_call_operand.hbm [shape: bf16[128,256], index: 4, kind: input, shape index: {}]   ;;  %s1623_s5 = inlined_call_operand.vmem [shape: f32[1,256], index: 5, kind: input, shape index: {}]   ;;  %s1624_s6 = inlined_call_operand.vmem [shape: f32[2,128], index: 6, kind: input, shape index: {}]   ;;  %s1625_s7 = inlined_call_operand.vmem [shape: f32[2,128], index: 7, kind: input, shape index: {}]   ;;  %s1626_s8 = inlined_call_operand.hbm [shape: f32[2,128], index: 8, kind: output, shape index: {0}]   ;;  %s1627_s9 = inlined_call_operand.hbm [shape: f32[1,8,128], index: 9, kind: output, shape index: {1}]  }
   0x1   :  { %16 = vsyncpa [#allocation7], 0 }
   0x2   :  { %17 = vsyncpa [#allocation10], 0 }
   0x3   :  { %18 = vsyncpa [#allocation5], 0 }
   0x4   :  { %19 = vsyncpa [#allocation13], 0  ;;  %s1506_s30 = smov [#allocation6]   ;;  %s1507_s11 = smov [#allocation3]  }
   0x5   :  { %s36_s10 = sshll.u32 %s1506_s30, 4  ;;  %s26_s12 = sshll.u32 %s1507_s11, 4  ;;  %s37_s10 = int_to_ptr.vmem [resolvable:$true] %s36_s10  ;;  %s27_s12 = int_to_ptr.vmem [resolvable:$true] %s26_s12 }
   0x6   :  { %s1384_s13 = scalar_lea.vmem %s37_s10, 256  ;;  %p1389_p1 = scmp.lt.s32.totalorder %s37_s10, %s37_s10 }
   0x7   :  { %p1385_p0 = scmp.ne.s32.totalorder %s37_s10, %s1384_s13  ;;  %p1390_p2 = scmp.lt.s32.totalorder %s1384_s13, %s1384_s13 }
   0x9   :  { %p1391_p3 = por %p1390_p2, %p1389_p1 }
   0xb   :  { %p1392_p4 = pnand %p1391_p3, %p1385_p0 }
   0xd   :  { %1395 = shalt.err (!%p1392_p4)
}
   0xe   :  { %39 = dma.hbm_to_vmem [thread:$0]  %s1619_s1, 256, %s37_s10, [#allocation7]  }
   0xf   :  { %s1404_s16 = scalar_lea.vmem %s27_s12, 16  ;;  %s1408_s17 = scalar_lea.vmem %s27_s12, 32 }
  0x10   :  { %p1405_p5 = scmp.ne.s32.totalorder %s27_s12, %s1404_s16  ;;  %p1409_p6 = scmp.lt.s32.totalorder %s27_s12, %s27_s12 }
  0x11   :  { %p1410_p7 = scmp.lt.s32.totalorder %s1408_s17, %s1404_s16 }
  0x13   :  { %p1411_p8 = por %p1410_p7, %p1409_p6 }
  0x15   :  { %p1412_p9 = pnand %p1411_p8, %p1405_p5 }
  0x17   :  { %1415 = shalt.err (!%p1412_p9)
}
  0x18   :  { %29 = dma.hbm_to_vmem [thread:$0]  %s1618_s0, 16, %s27_s12, [#allocation4]  }
  0x19   :  { %s1508_s20 = smov [#allocation8]  }
  0x1a   :  { %s45_s21 = sshll.u32 %s1508_s20, 4  ;;  %s46_s21 = int_to_ptr.vmem [resolvable:$true] %s45_s21 }
  0x1b   :  { %s1424_s22 = scalar_lea.vmem %s46_s21, 8192  ;;  %p1429_p11 = scmp.lt.s32.totalorder %s46_s21, %s46_s21 }
  0x1c   :  { %p1425_p10 = scmp.ne.s32.totalorder %s46_s21, %s1424_s22  ;;  %p1430_p12 = scmp.lt.s32.totalorder %s1424_s22, %s1424_s22 }
  0x1e   :  { %p1431_p13 = por %p1430_p12, %p1429_p11 }
  0x20   :  { %p1432_p0 = pnand %p1431_p13, %p1425_p10 }
  0x22   :  { %1435 = shalt.err (!%p1432_p0)
}
  0x23   :  { %s1509_s1 = smov 64   ;;  %s1510_s23 = smov 4  }
  0x24   :  { %51 = dma.hbm_to_vmem [thread:$0]  %s1620_s2, 8192, %s46_s21, [#allocation7], %s1509_s1, %s1509_s1, %s1510_s23  }
  0x25   :  { %s1511_s26 = smov [#allocation9]  }
  0x26   :  { %s59_s27 = sshll.u32 %s1511_s26, 4  ;;  %s60_s27 = int_to_ptr.vmem [resolvable:$true] %s59_s27 }
  0x27   :  { %s1444_s0 = scalar_lea.vmem %s60_s27, 2048  ;;  %p1449_p2 = scmp.lt.s32.totalorder %s60_s27, %s60_s27 }
  0x28   :  { %p1445_p1 = scmp.ne.s32.totalorder %s60_s27, %s1444_s0  ;;  %p1450_p3 = scmp.lt.s32.totalorder %s1444_s0, %s1444_s0 }
  0x2a   :  { %p1451_p4 = por %p1450_p3, %p1449_p2 }
  0x2c   :  { %p1452_p5 = pnand %p1451_p4, %p1445_p1 }
  0x2e   :  { %1455 = shalt.err (!%p1452_p5)
}
  0x2f   :  { %s1512_s28 = smov 128   ;;  %s1513_s29 = smov 8  }
  0x30   :  { %65 = dma.hbm_to_vmem [thread:$0]  %s1622_s4, 2048, %s60_s27, [#allocation10], %s1512_s28, %s1512_s28, %s1513_s29  }
  0x31   :  { %1496 = dma.done.wait [#allocation4], 16  }
  0x32   :  { %1497 = vsyncadd [#allocation4], 4294967280 }
  0x33   :  { %1498 = dma.done.wait [#allocation7], 8448  }
  0x34   :  { %1499 = vsyncadd [#allocation7], 4294958848 }
  0x35   :  { %1500 = dma.done.wait [#allocation10], 2048  }
  0x36   :  { %1501 = vsyncadd [#allocation10], 4294965248  ;;  %v1278_v0 = vld [vmem:[#allocation8 + $0x78] sm:$0xff]   ;;  %v1282_v4 = vld [vmem:[#allocation8 + $0x70] sm:$0xff]   ;;  %v1514_v22 = vmov 1983009808   ;;  %v99_v24 = vlaneseq }
  0x37   :  { %v1279_v1 = vld [vmem:[#allocation8 + $0xf8] sm:$0xff]   ;;  %1173 = vmatprep.subr.bf16.mxu0 %v1278_v0  ;;  %v1283_v5 = vld [vmem:[#allocation8 + $0xf0] sm:$0xff]   ;;  %v1286_v8 = vld [vmem:[#allocation8 + $0x68] sm:$0xff]   ;;  %v97_v23 = vunpack.c.l.s4 %v1514_v22  ;;  %vm1008_vm1 = vcmask 1041408  }
  0x38   :  { %v1280_v2 = vld [vmem:[#allocation8 + $0x38] sm:$0xff]   ;;  %1195 = vmatprep.subr.bf16.mxu1 %v1279_v1  ;;  %v1284_v6 = vld [vmem:[#allocation8 + $0x30] sm:$0xff]   ;;  %v1287_v9 = vld [vmem:[#allocation8 + $0xe8] sm:$0xff]   ;;  %v1582_v30 = vshrl.u32 %v99_v24, 7 }
  0x39   :  { %v1281_v3 = vld [vmem:[#allocation8 + $0xb8] sm:$0xff]   ;;  %1174 = vmatpush3.bf16.msra.mxu0 %v1280_v2  ;;  %v1285_v7 = vld [vmem:[#allocation8 + $0xb0] sm:$0xff]   ;;  %v1288_v10 = vld [vmem:[#allocation8 + $0x28] sm:$0xff]   ;;  %v98_v29 = vunpack.c.0.s8 %v97_v23 }
  0x3a   :  { %1196 = vmatpush3.bf16.msra.mxu1 %v1281_v3  ;;  %1175 = vmatprep.subr.bf16.mxu0 %v1282_v4  ;;  %v1289_v11 = vld [vmem:[#allocation8 + $0xa8] sm:$0xff]   ;;  %v1290_v12 = vld [vmem:[#allocation8 + $0x60] sm:$0xff]   ;;  %v1294_v16 = vld [vmem:[#allocation8 + $0x58] sm:$0xff]  }
  0x3b   :  { %1197 = vmatprep.subr.bf16.mxu1 %v1283_v5  ;;  %v1291_v13 = vld [vmem:[#allocation8 + $0xe0] sm:$0xff]   ;;  %v1295_v17 = vld [vmem:[#allocation8 + $0xd8] sm:$0xff]   ;;  %v1298_v20 = vld [vmem:[#allocation8 + $0x50] sm:$0xff]   ;;  %v1585_v35 = vsub.s32 %v98_v29, %v1582_v30 }
  0x3c   :  { %v1292_v14 = vld [vmem:[#allocation8 + $0x20] sm:$0xff]   ;;  %v1296_v18 = vld [vmem:[#allocation8 + $0x18] sm:$0xff]   ;;  %v1299_v21 = vld [vmem:[#allocation8 + $0xd0] sm:$0xff]  }
  0x3d   :  { %1176 = vmatpush3.bf16.msra.mxu0 %v1284_v6  ;;  %v1293_v15 = vld [vmem:[#allocation8 + $0xa0] sm:$0xff]   ;;  %v1297_v19 = vld [vmem:[#allocation8 + $0x98] sm:$0xff]   ;;  %v1300_v25 = vld [vmem:[#allocation8 + $0x10] sm:$0xff]  }
  0x3e   :  { %1198 = vmatpush3.bf16.msra.mxu1 %v1285_v7  ;;  %1177 = vmatprep.subr.bf16.mxu0 %v1286_v8  ;;  %v1301_v26 = vld [vmem:[#allocation8 + $0x90] sm:$0xff]   ;;  %v1302_v27 = vld [vmem:[#allocation8 + $0x48] sm:$0xff]   ;;  %v1306_v33 = vld [vmem:[#allocation8 + $0x40] sm:$0xff]  }
  0x3f   :  { %1199 = vmatprep.subr.bf16.mxu1 %v1287_v9  ;;  %v1303_v28 = vld [vmem:[#allocation8 + $0xc8] sm:$0xff]   ;;  %v1307_v34 = vld [vmem:[#allocation8 + $0xc0] sm:$0xff]   ;;  %v91_v38 = vld [vmem:[#allocation6] sm:$0xff] }
  0x40   :  { %v1304_v31 = vld [vmem:[#allocation8 + $0x8] sm:$0xff]   ;;  %v1308_v36 = vld [vmem:[#allocation8] sm:$0xff]   ;;  %v102_v39 = vrot.slane %v91_v38, %v1585_v35  ;;  %v95_v40 = vcombine.high %v91_v38, %v91_v38  ;;  %v1311_v41 = vld [vmem:[#allocation8 + $0x178] sm:$0xff]  }
  0x41   :  { %1178 = vmatpush3.bf16.msra.mxu0 %v1288_v10  ;;  %v1305_v32 = vld [vmem:[#allocation8 + $0x88] sm:$0xff]   ;;  %v1309_v37 = vld [vmem:[#allocation8 + $0x80] sm:$0xff]   ;;  %v1312_v42 = vld [vmem:[#allocation8 + $0x1f8] sm:$0xff]  }
  0x42   :  { %1200 = vmatpush3.bf16.msra.mxu1 %v1289_v11  ;;  %1179 = vmatprep.subr.bf16.mxu0 %v1290_v12  ;;  %v110_v43 = vcombine.high %v102_v39, %v102_v39  ;;  %v109_v44 = vrot.slane %v95_v40, %v1585_v35  ;;  %v137_v45 = vpack.c.bf16 %v102_v39, %v102_v39  ;;  %v1313_v46 = vld [vmem:[#allocation8 + $0x138] sm:$0xff]   ;;  %v1315_v51 = vld [vmem:[#allocation8 + $0x170] sm:$0xff]   ;;  %v1319_v56 = vld [vmem:[#allocation8 + $0x168] sm:$0xff]  }
  0x43   :  { %1201 = vmatprep.subr.bf16.mxu1 %v1291_v13  ;;  %v1314_v49 = vld [vmem:[#allocation8 + $0x1b8] sm:$0xff]   ;;  %v1316_v53 = vld [vmem:[#allocation8 + $0x1f0] sm:$0xff]   ;;  %v1320_v57 = vld [vmem:[#allocation8 + $0x1e8] sm:$0xff]  }
  0x44   :  { %v138_v47 = vpack.c.bf16 %v110_v43, %v110_v43  ;;  %v111_v48 = vcombine.high %v109_v44, %v109_v44  ;;  %v139_v50 = vpack.c.bf16 %v109_v44, %v109_v44  ;;  %v1317_v54 = vld [vmem:[#allocation8 + $0x130] sm:$0xff]   ;;  %v1321_v58 = vld [vmem:[#allocation8 + $0x128] sm:$0xff]   ;;  %v1323_v60 = vld [vmem:[#allocation8 + $0x160] sm:$0xff]  }
  0x45   :  { %1180 = vmatpush3.bf16.msra.mxu0 %v1292_v14  ;;  %v1318_v55 = vld [vmem:[#allocation8 + $0x1b0] sm:$0xff]   ;;  %v1322_v59 = vld [vmem:[#allocation8 + $0x1a8] sm:$0xff]   ;;  %v1324_v61 = vld [vmem:[#allocation8 + $0x1e0] sm:$0xff]  }
  0x46   :  { %1202 = vmatpush3.bf16.msra.mxu1 %v1293_v15  ;;  %1181 = vmatprep.subr.bf16.mxu0 %v1294_v16  ;;  %v140_v52 = vpack.c.bf16 %v111_v48, %v111_v48  ;;  %v1325_v62 = vld [vmem:[#allocation8 + $0x120] sm:$0xff]   ;;  %v1327_v0 = vld [vmem:[#allocation8 + $0x158] sm:$0xff]   ;;  %v1331_v4 = vld [vmem:[#allocation8 + $0x150] sm:$0xff]  }
  0x47   :  { %1203 = vmatprep.subr.bf16.mxu1 %v1295_v17  ;;  %689 = vmatprep.mubr.bf16.mxu0 %v138_v47  ;;  %v1326_v63 = vld [vmem:[#allocation8 + $0x1a0] sm:$0xff]   ;;  %v1328_v1 = vld [vmem:[#allocation8 + $0x1d8] sm:$0xff]   ;;  %v1332_v5 = vld [vmem:[#allocation8 + $0x1d0] sm:$0xff]  }
  0x48   :  { %729 = vmatprep.mubr.bf16.mxu1 %v140_v52  ;;  %v1329_v2 = vld [vmem:[#allocation8 + $0x118] sm:$0xff]   ;;  %v1333_v6 = vld [vmem:[#allocation8 + $0x110] sm:$0xff]   ;;  %v1335_v8 = vld [vmem:[#allocation8 + $0x148] sm:$0xff]  }
  0x49   :  { %1182 = vmatpush3.bf16.msra.mxu0 %v1296_v18  ;;  %v1330_v3 = vld [vmem:[#allocation8 + $0x198] sm:$0xff]   ;;  %v1334_v7 = vld [vmem:[#allocation8 + $0x190] sm:$0xff]   ;;  %v1336_v9 = vld [vmem:[#allocation8 + $0x1c8] sm:$0xff]  }
  0x4a   :  { %1204 = vmatpush3.bf16.msra.mxu1 %v1297_v19  ;;  %1183 = vmatprep.subr.bf16.mxu0 %v1298_v20  ;;  %v1337_v10 = vld [vmem:[#allocation8 + $0x108] sm:$0xff]   ;;  %v1339_v12 = vld [vmem:[#allocation8 + $0x140] sm:$0xff]   ;;  %v92_v15 = vld [vmem:[#allocation6 + $0x8] sm:$0xff] }
  0x4b   :  { %1205 = vmatprep.subr.bf16.mxu1 %v1299_v21  ;;  %v1338_v11 = vld [vmem:[#allocation8 + $0x188] sm:$0xff]   ;;  %v1340_v13 = vld [vmem:[#allocation8 + $0x1c0] sm:$0xff]   ;;  %v119_v17 = vrot.slane %v92_v15, %v1585_v35  ;;  %v112_v18 = vcombine.high %v92_v15, %v92_v15  ;;  %v1356_v38 = vld [vmem:[#allocation9 + $0x30] ss:$8 sps:$4 sm:$0xff]   ;;  %v1005_v15 = vand.u32 127, %v99_v24 }
  0x4c   :  { %v1341_v14 = vld [vmem:[#allocation8 + $0x100] sm:$0xff]   ;;  %v1362_v43 = vld [vmem:[#allocation9 + $0x10] ss:$8 sps:$4 sm:$0xff]  }
  0x4d   :  { %1184 = vmatpush3.bf16.msra.mxu0 %v1300_v25  ;;  %v1342_v16 = vld [vmem:[#allocation8 + $0x180] sm:$0xff]   ;;  %v127_v19 = vcombine.high %v119_v17, %v119_v17  ;;  %v126_v20 = vrot.slane %v112_v18, %v1585_v35  ;;  %v141_v21 = vpack.c.bf16 %v119_v17, %v119_v17  ;;  %vm1006_vm0 = vcmp.lt.s32.totalorder %v1005_v15, 16 }
  0x4e   :  { %1206 = vmatpush3.bf16.msra.mxu1 %v1301_v26  ;;  %1185 = vmatprep.subr.bf16.mxu0 %v1302_v27  ;;  %v1344_v27 = vld [vmem:[#allocation9 + $0x70] ss:$8 sps:$4 sm:$0xff]   ;;  %v1349_v29 = vld [vmem:[#allocation9 + $0x64] ss:$8 sps:$4 sm:$0xff]   ;;  %v1359_v40 = vld [vmem:[#allocation9 + $0x20] ss:$8 sps:$4 sm:$0xff]  }
  0x4f   :  { %1207 = vmatprep.subr.bf16.mxu1 %v1303_v28  ;;  %v142_v22 = vpack.c.bf16 %v127_v19, %v127_v19  ;;  %v128_v23 = vcombine.high %v126_v20, %v126_v20  ;;  %v143_v25 = vpack.c.bf16 %v126_v20, %v126_v20  ;;  %v1346_v28 = vld [vmem:[#allocation9 + $0x74] ss:$8 sps:$4 sm:$0xff]   ;;  %v1355_v35 = vld [vmem:[#allocation9 + $0x44] ss:$8 sps:$4 sm:$0xff]  }
  0x50   :  { %v1361_v39 = vld [vmem:[#allocation9 + $0x24] ss:$8 sps:$4 sm:$0xff]  }
  0x51   :  { %1186 = vmatpush3.bf16.msra.mxu0 %v1304_v31  ;;  %v144_v26 = vpack.c.bf16 %v128_v23, %v128_v23  ;;  %v1347_v31 = vld [vmem:[#allocation9 + $0x60] ss:$8 sps:$4 sm:$0xff]   ;;  %v1367_v44 = vld [vmem:[#allocation9 + $0x4] ss:$8 sps:$4 sm:$0xff]  }
  0x52   :  { %1208 = vmatpush3.bf16.msra.mxu1 %v1305_v32  ;;  %1187 = vmatprep.subr.bf16.mxu0 %v1306_v33  ;;  %v1352_v32 = vld [vmem:[#allocation9 + $0x54] ss:$8 sps:$4 sm:$0xff]   ;;  %v1350_v33 = vld [vmem:[#allocation9 + $0x50] ss:$8 sps:$4 sm:$0xff]  }
  0x53   :  { %1209 = vmatprep.subr.bf16.mxu1 %v1307_v34  ;;  %v1515_v34 = vmov 0.0  }
  0x54   :  { %89 = vst [vmem:[#allocation2] sm:$0x3] %v1515_v34 }
  0x55   :  { %1188 = vmatpush3.bf16.msra.mxu0 %v1308_v36  ;;  %v1353_v36 = vld [vmem:[#allocation9 + $0x40] ss:$8 sps:$4 sm:$0xff]  }
  0x56   :  { %1210 = vmatpush3.bf16.msra.mxu1 %v1309_v37  ;;  %1217 = vmatprep.subr.bf16.mxu0 %v1311_v41  ;;  %v1358_v37 = vld [vmem:[#allocation9 + $0x34] ss:$8 sps:$4 sm:$0xff]  }
  0x57   :  { %1239 = vmatprep.subr.bf16.mxu1 %v1312_v42  ;;  %v1364_v41 = vld [vmem:[#allocation9 + $0x14] ss:$8 sps:$4 sm:$0xff]   ;;  %v1516_v42 = vmov 0  }
  0x58   :  { %690 = vmatmul.mubr.bf16.vlgmr.msra.gmra.mxu0 %v137_v45  ;;  %v1365_v45 = vld [vmem:[#allocation9] ss:$8 sps:$4 sm:$0xff]  }
  0x59   :  { %1218 = vmatpush3.bf16.msra.mxu0 %v1313_v46  ;;  %730 = vmatmul.mubr.bf16.vlgmr.msra.gmra.mxu1 %v139_v50 }
  0x5a   :  { %1219 = vmatprep.subr.bf16.mxu0 %v1315_v51  ;;  %1240 = vmatpush3.bf16.msra.mxu1 %v1314_v49 }
  0x5b   :  { %1241 = vmatprep.subr.bf16.mxu1 %v1316_v53  ;;  %769 = vmatprep.mubr.bf16.mxu0 %v142_v22 }
  0x5c   :  { %809 = vmatprep.mubr.bf16.mxu1 %v144_v26 }
  0x5d   :  { %1220 = vmatpush3.bf16.msra.mxu0 %v1317_v54 }
  0x5e   :  { %1221 = vmatprep.subr.bf16.mxu0 %v1319_v56  ;;  %1242 = vmatpush3.bf16.msra.mxu1 %v1318_v55 }
  0x5f   :  { %1243 = vmatprep.subr.bf16.mxu1 %v1320_v57 }
  0x61   :  { %1222 = vmatpush3.bf16.msra.mxu0 %v1321_v58 }
  0x62   :  { %1223 = vmatprep.subr.bf16.mxu0 %v1323_v60  ;;  %1244 = vmatpush3.bf16.msra.mxu1 %v1322_v59 }
  0x63   :  { %1245 = vmatprep.subr.bf16.mxu1 %v1324_v61 }
  0x65   :  { %1224 = vmatpush3.bf16.msra.mxu0 %v1325_v62 }
  0x66   :  { %1225 = vmatprep.subr.bf16.mxu0 %v1327_v0  ;;  %1246 = vmatpush3.bf16.msra.mxu1 %v1326_v63 }
  0x67   :  { %1247 = vmatprep.subr.bf16.mxu1 %v1328_v1  ;;  %v90_v1 = vld [vmem:[#allocation2] sm:$0x3] }
  0x69   :  { %1226 = vmatpush3.bf16.msra.mxu0 %v1329_v2 }
  0x6a   :  { %1227 = vmatprep.subr.bf16.mxu0 %v1331_v4  ;;  %1248 = vmatpush3.bf16.msra.mxu1 %v1330_v3 }
  0x6b   :  { %1249 = vmatprep.subr.bf16.mxu1 %v1332_v5 }
  0x6d   :  { %1228 = vmatpush3.bf16.msra.mxu0 %v1333_v6 }
  0x6e   :  { %1229 = vmatprep.subr.bf16.mxu0 %v1335_v8  ;;  %1250 = vmatpush3.bf16.msra.mxu1 %v1334_v7  ;;  %v1156_v7 = vld [vmem:[%s1621_s3] ss:$0 sm:$0xff] }
  0x6f   :  { %1251 = vmatprep.subr.bf16.mxu1 %v1336_v9 }
  0x71   :  { %1230 = vmatpush3.bf16.msra.mxu0 %v1337_v10 }
  0x72   :  { %1231 = vmatprep.subr.bf16.mxu0 %v1339_v12  ;;  %1252 = vmatpush3.bf16.msra.mxu1 %v1338_v11  ;;  %v827_v12 = vsub.s32 0, %v1582_v30 }
  0x73   :  { %1253 = vmatprep.subr.bf16.mxu1 %v1340_v13  ;;  %v868_v13 = vld [vmem:[%s1623_s5] sm:$0x3] }
  0x75   :  { %1232 = vmatpush3.bf16.msra.mxu0 %v1341_v14  ;;  %v876_v14 = vsub.s32 1, %v1582_v30 }
  0x76   :  { %1254 = vmatpush3.bf16.msra.mxu1 %v1342_v16  ;;  %960 = vmatprep.subr.bf16.mxu0 %v1346_v28  ;;  %v873_v16 = vrot.slane %v868_v13, %v827_v12 }
  0x77   :  { %v877_v17 = vrot.slane %v868_v13, %v876_v14 }
  0x78   :  { %770 = vmatmul.mubr.bf16.vlgmr.msra.gmra.mxu0 %v141_v21 }
  0x79   :  { %810 = vmatmul.mubr.bf16.vlgmr.msra.gmra.mxu1 %v143_v25  ;;  %961 = vmatpush1.bf16.msra.mxu0 %v1344_v27 }
  0x7a   :  { %962 = vmatprep.subr.bf16.mxu0 %v1349_v29  ;;  %992 = vmatprep.mubr.bf16.mxu0 %v1516_v42 }
  0x7d   :  { %963 = vmatpush1.bf16.msra.mxu0 %v1347_v31 }
  0x7e   :  { %964 = vmatprep.subr.bf16.mxu0 %v1352_v32 }
  0x81   :  { %965 = vmatpush1.bf16.msra.mxu0 %v1350_v33 }
  0x82   :  { %966 = vmatprep.subr.bf16.mxu0 %v1355_v35 }
  0x85   :  { %967 = vmatpush1.bf16.msra.mxu0 %v1353_v36 }
  0x86   :  { %968 = vmatprep.subr.bf16.mxu0 %v1358_v37 }
  0x89   :  { %969 = vmatpush1.bf16.msra.mxu0 %v1356_v38 }
  0x8a   :  { %970 = vmatprep.subr.bf16.mxu0 %v1361_v39 }
  0x8d   :  { %971 = vmatpush1.bf16.msra.mxu0 %v1359_v40 }
  0x8e   :  { %972 = vmatprep.subr.bf16.mxu0 %v1364_v41  ;;  %v822_v41 = vld [vmem:[#allocation3] sm:$0x1] }
  0x8f   :  { %v831_v42 = vsub.f32 1.0, %v822_v41 }
  0x91   :  { %973 = vmatpush1.bf16.msra.mxu0 %v1362_v43 }
  0x92   :  { %974 = vmatprep.subr.bf16.mxu0 %v1367_v44  ;;  %v828_v44 = vrot.slane %v822_v41, %v827_v12 }
  0x95   :  { %975 = vmatpush1.bf16.msra.mxu0 %v1365_v45  ;;  %v837_v45 = vrot.slane %v831_v42, %v827_v12 }
 0x118   :  { %v1189_v46 = vpop.f32.mrf.mxu0 }
 0x119   :  { %v1211_v47 = vpop.f32.mrf.mxu1 }
 0x11a   :  { %v1190_v48 = vpop.f32.mrf.mxu0 }
 0x11b   :  { %v1212_v49 = vpop.f32.mrf.mxu1  ;;  %v1191_v54 = vadd.f32 %v1190_v48, %v1189_v46  ;;  %v823_v46 = vld [vmem:[%s1624_s6] sm:$0x3]  ;;  %s1517_s6 = smov [#allocation11]  }
 0x11c   :  { %v1192_v50 = vpop.f32.mrf.mxu0  ;;  %v1213_v55 = vadd.f32 %v1212_v49, %v1211_v47  ;;  %v832_v47 = vld [vmem:[%s1625_s7] sm:$0x3]  ;;  %v830_v48 = vmul.f32 %v828_v44, %v823_v46  ;;  %s1067_s15 = sshll.u32 %s1517_s6, 4  ;;  %s1068_s15 = int_to_ptr.vmem [resolvable:$true] %s1067_s15 }
 0x11d   :  { %v1214_v51 = vpop.f32.mrf.mxu1  ;;  %v839_v49 = vmul.f32 %v837_v45, %v832_v47  ;;  %s1456_s7 = scalar_lea.vmem %s1068_s15, 32  ;;  %p1461_p7 = scmp.lt.s32.totalorder %s1068_s15, %s1068_s15 }
 0x11e   :  { %v1193_v52 = vpop.f32.mrf.mxu0  ;;  %v732_v59 = vadd.f32 %v1213_v55, %v1191_v54  ;;  %p1457_p6 = scmp.ne.s32.totalorder %s1068_s15, %s1456_s7  ;;  %p1462_p8 = scmp.lt.s32.totalorder %s1456_s7, %s1456_s7 }
 0x11f   :  { %v1215_v53 = vpop.f32.mrf.mxu1  ;;  %v840_v52 = vadd.f32 %v839_v49, %v830_v48 }
 0x120   :  { %p1463_p9 = por %p1462_p8, %p1461_p7 }
 0x122   :  { %p1464_p10 = pnand %p1463_p9, %p1457_p6 }
 0x138   :  { %v1233_v56 = vpop.f32.mrf.mxu0 }
 0x139   :  { %v1255_v57 = vpop.f32.mrf.mxu1 }
 0x13a   :  { %v1234_v58 = vpop.f32.mrf.mxu0 }
 0x13b   :  { %v1235_v60 = vadd.f32 %v1234_v58, %v1233_v56  ;;  %v1256_v61 = vpop.f32.mrf.mxu1 }
 0x13c   :  { %v1236_v62 = vpop.f32.mrf.mxu0  ;;  %v1257_v0 = vadd.f32 %v1256_v61, %v1255_v57 }
 0x13d   :  { %v772_v63 = vadd.f32 %v1235_v60, %v732_v59  ;;  %v1258_v2 = vpop.f32.mrf.mxu1 }
 0x13e   :  { %v1237_v3 = vpop.f32.mrf.mxu0 }
 0x13f   :  { %v812_v4 = vadd.f32 %v1257_v0, %v772_v63  ;;  %v1259_v5 = vpop.f32.mrf.mxu1 }
 0x141   :  { %v817_v6 = vadd.f32 %v812_v4, %v90_v1 }
 0x143   :  { %818 = vst [vmem:[#allocation2] sm:$0x3] %v817_v6 }
 0x14a   :  { %v841_v8 = vld [vmem:[#allocation2] sm:$0x3] }
 0x14b   :  { %v849_v9 = vadd.f32 %v1156_v7, %v841_v8 }
 0x14d   :  { %v850_v10 = vmax.f32 %v849_v9, 0.0 }
 0x14f   :  { %v851_v11 = vpack.c.bf16 %v850_v10, %v850_v10 }
 0x151   :  { %993 = vmatmul.mubr.bf16.vlgmr.msra.gmra.mxu0 %v851_v11 }
 0x211   :  { %v994_v18 = vpop.f32.mrf.mxu0 }
 0x212   :  { %v995_v19 = vadd.f32 %v994_v18, %v873_v16 }
 0x213   :  { %v996_v20 = vpop.f32.mrf.mxu0 }
 0x214   :  { %v997_v21 = vadd.f32 %v996_v20, %v877_v17  ;;  %v1007_v22 = vsel %vm1006_vm0, %v995_v19, -1e+30 }
 0x215   :  { %v998_v23 = vpop.f32.mrf.mxu0  ;;  %v1009_v25 = vsel %vm1008_vm1, %v1007_v22, -inf }
 0x216   :  { %v1001_v26 = vadd.f32 %v997_v21, %v995_v19  ;;  %1010 = vmax.xlane.f32.xlu0 %v1009_v25  ;;  %v1032_v27 = vsel %vm1006_vm0, %v997_v21, -1e+30 }
 0x217   :  { %v999_v28 = vpop.f32.mrf.mxu0  ;;  %v1033_v30 = vsel %vm1008_vm1, %v1032_v27, -inf }
 0x218   :  { %v1002_v29 = vmul.f32 0.5, %v1001_v26 }
 0x21a   :  { %1003 = vst [vmem:[#allocation11] sm:$0x3] %v1002_v29  ;;  %1034 = vmax.xlane.f32.xlu0 %v1033_v30 }
 0x29f   :  { %v1011_v24 = vpop.xlane.xlu0 %1010 }
 0x2a0   :  { %v1012_v31 = vsub.f32 %v1007_v22, %v1011_v24 }
 0x2a2   :  { %v1013_v32 = vmul.f32 1.442695, %v1012_v31 }
 0x2a3   :  { %v1035_v33 = vpop.xlane.xlu0 %1034 }
 0x2a4   :  { %1368 = vpow2.f32 %v1013_v32  ;;  %v1036_v34 = vsub.f32 %v1032_v27, %v1035_v33 }
 0x2a6   :  { %v1037_v35 = vmul.f32 1.442695, %v1036_v34 }
 0x2a8   :  { %1370 = vpow2.f32 %v1037_v35 }
 0x2b1   :  { %v1369_v36 = vpop.eup %1368 }
 0x2b2   :  { %v1015_v37 = vsel %vm1008_vm1, %v1369_v36, 0.0 }
 0x2b3   :  { %1016 = vadd.xlane.f32.xlu1 %v1015_v37 }
 0x2b5   :  { %v1371_v38 = vpop.eup %1370 }
 0x2b6   :  { %v1039_v39 = vsel %vm1008_vm1, %v1371_v38, 0.0 }
 0x2b7   :  { %1040 = vadd.xlane.f32.xlu1 %v1039_v39 }
 0x33c   :  { %v1017_v40 = vpop.xlane.xlu1 %1016 }
 0x33d   :  { %1372 = vlog2.f32 %v1017_v40 }
 0x340   :  { %v1041_v43 = vpop.xlane.xlu1 %1040 }
 0x341   :  { %1374 = vlog2.f32 %v1041_v43 }
 0x34a   :  { %v1373_v50 = vpop.eup %1372 }
 0x34b   :  { %v1019_v51 = vmul.f32 0.6931472, %v1373_v50 }
 0x34d   :  { %v1020_v53 = vsub.f32 %v1012_v31, %v1019_v51 }
 0x34e   :  { %v1375_v54 = vpop.eup %1374 }
 0x34f   :  { %v1043_v55 = vmul.f32 0.6931472, %v1375_v54  ;;  %v1021_v56 = vmul.f32 %v1020_v53, %v840_v52 }
 0x351   :  { %v1022_v57 = vsel %vm1008_vm1, %v1021_v56, 0.0  ;;  %v1044_v58 = vsub.f32 %v1036_v34, %v1043_v55 }
 0x352   :  { %1023 = vadd.xlane.f32.xlu0 %v1022_v57 }
 0x353   :  { %v1045_v59 = vmul.f32 %v1044_v58, %v840_v52 }
 0x355   :  { %v1046_v60 = vsel %vm1008_vm1, %v1045_v59, 0.0 }
 0x356   :  { %1047 = vadd.xlane.f32.xlu1 %v1046_v60 }
 0x357   :  { %1467 = shalt.err (!%p1464_p10)
}
 0x358   :  { %1070 = dma.vmem_to_hbm [thread:$0]  %s1068_s15, 32, %s1626_s8, [#allocation5]  }
 0x359   :  { %s1518_s21 = smov [#allocation12]  }
 0x35a   :  { %s1077_s22 = sshll.u32 %s1518_s21, 4  ;;  %s1078_s22 = int_to_ptr.vmem [resolvable:$true] %s1077_s22 }
 0x35b   :  { %s1476_s23 = scalar_lea.vmem %s1078_s22, 128  ;;  %p1481_p12 = scmp.lt.s32.totalorder %s1078_s22, %s1078_s22 }
 0x35c   :  { %p1477_p11 = scmp.ne.s32.totalorder %s1078_s22, %s1476_s23  ;;  %p1482_p13 = scmp.lt.s32.totalorder %s1476_s23, %s1476_s23 }
 0x35e   :  { %p1483_p0 = por %p1482_p13, %p1481_p12 }
 0x360   :  { %p1484_p1 = pnand %p1483_p0, %p1477_p11 }
 0x3db   :  { %v1024_v61 = vpop.xlane.xlu0 %1023 }
 0x3dc   :  { %v1025_v62 = vrot.slane %v1024_v61, 4 }
 0x3de   :  { %v1026_v63 = vadd.f32 %v1025_v62, %v1024_v61 }
 0x3df   :  { %v1048_v0 = vpop.xlane.xlu1 %1047 }
 0x3e0   :  { %v1027_v1 = vrot.slane %v1026_v63, 2  ;;  %v1049_v2 = vrot.slane %v1048_v0, 4 }
 0x3e2   :  { %v1050_v3 = vadd.f32 %v1049_v2, %v1048_v0  ;;  %v1028_v4 = vadd.f32 %v1027_v1, %v1026_v63 }
 0x3e4   :  { %v1051_v5 = vrot.slane %v1050_v3, 2  ;;  %v1029_v6 = vrot.slane %v1028_v4, 1 }
 0x3e6   :  { %v1052_v7 = vadd.f32 %v1051_v5, %v1050_v3  ;;  %v1030_v8 = vadd.f32 %v1029_v6, %v1028_v4 }
 0x3e8   :  { %1261 = vpush %v1030_v8  ;;  %v1053_v9 = vrot.slane %v1052_v7, 1 }
 0x3ea   :  { %v1054_v10 = vadd.f32 %v1053_v9, %v1052_v7 }
 0x3ec   :  { %1263 = vpush %v1054_v10 }
 0x419   :  { %s1262_s18 = spop %1261 }
 0x41d   :  { %s1264_s19 = spop %1263 }
 0x41e   :  { %s1056_s20 = sadd.f32 %s1264_s19, %s1262_s18 }
 0x420   :  { %s1057_s8 = ssub.f32 0.0, %s1056_s20 }
 0x422   :  { %s1058_s1 = smul.f32 0.25, %s1057_s8 }
 0x424   :  { %v1059_v11 = vstv %s1058_s1 }
 0x425   :  { %1060 = vst [vmem:[#allocation12] sm:$0xff] %v1059_v11 }
 0x426   :  { %1487 = shalt.err (!%p1484_p1)
}
 0x427   :  { %1080 = dma.vmem_to_hbm [thread:$0]  %s1078_s22, 128, %s1627_s9, [#allocation13]  }
 0x428   :  { %1502 = dma.done.wait [#allocation5], 32  }
 0x429   :  { %1503 = vsyncadd [#allocation5], 4294967264 }
 0x42a   :  { %1504 = dma.done.wait [#allocation13], 128  }
 0x42b   :  { %1505 = vsyncadd [#allocation13], 4294967168 }
 0x42c   :  { %1087 = vsyncpa [#allocation4], 1 }
 0x42d   :  { %1088 = vsyncpa [#allocation7], 1 }
 0x42e   :  { %1089 = vsyncpa [#allocation10], 1 }
 0x42f   :  { %1090 = vsyncpa [#allocation5], 1 }
 0x430   :  { %1091 = vsyncpa [#allocation13], 1 }

</bundles_post_ra>
